<compile_context>
chip_gen: v7x
topology: tpu7x:2x2x1
jax: 0.10.0
libtpu: 0.0.40
codegen_flags: <defaults>
</compile_context>

<pallas_src>
import numpy as np
import jax
import jax.numpy as jnp
from jax.experimental import pallas as pl
from jax.experimental.pallas import tpu as pltpu

SIGMA = 10.0
SIGMA_COLOR = -1.0 / (2.0 * SIGMA * SIGMA)

_MAT = np.array([[0.257, -0.148, 0.439],
                 [0.564, -0.291, -0.368],
                 [0.098, 0.439, -0.071]], dtype=np.float32)
_BIAS = np.array([16.0 / 255.0, 128.0 / 255.0, 128.0 / 255.0], dtype=np.float32)

# (dh, dw) offsets of w1..w24 in the torch module (used only by the reference).
_OFFSETS_24 = [
    (1, 0), (-1, 0), (0, 1), (0, -1),
    (-1, -1), (1, 1), (1, -1), (-1, 1),
    (2, 0), (-2, 0), (0, 2), (0, -2),
    (-2, -1), (2, 1), (2, -1), (-2, 1),
    (-1, -2), (1, 2), (1, -2), (-1, 2),
    (-2, -2), (2, 2), (2, -2), (-2, 2),
]

# One representative per +/- pair; total loss = 2 * sum over these 12.
_PAIR_REPS = [
    (1, 0), (0, 1), (1, 1), (1, -1),
    (2, 0), (0, 2), (2, 1), (2, -1),
    (1, 2), (1, -2), (2, 2), (2, -2),
]


def _transform_coef_table(L):
    """Rows: [bias, coef_{-2}, ..., coef_{+2}] of the flat-triple affine transform.

    ycc_flat[f] = bias[f%3] + sum_d coef_d[f%3] * x_flat[f+d]  (coef 0 outside the triple).
    """
    j = np.arange(L) % 3
    tab = np.zeros((1, 6, L), np.float32)
    tab[0, 0] = _BIAS[j]
    for d in range(-2, 3):
        row = np.zeros(L, np.float32)
        ok = (j + d >= 0) & (j + d <= 2)
        row[ok] = _MAT[(j + d)[ok], j[ok]]
        tab[0, 1 + d + 2] = row
    return tab


def _term_weight_table(H, W):
    """Per-term (valid-region mask * 1/count) over the flattened H*W plane."""
    P = H * W
    hh = np.arange(P) // W
    ww = np.arange(P) % W
    tab = np.zeros((1, len(_PAIR_REPS), P), np.float32)
    for t, (dh, dw) in enumerate(_PAIR_REPS):
        ok = ((hh >= max(dh, 0)) & (hh < H + min(dh, 0))
              & (ww >= max(dw, 0)) & (ww < W + min(dw, 0)))
        tab[0, t, ok] = 1.0 / float((H - abs(dh)) * (W - abs(dw)))
    return tab


def smooth_loss(inp, out):
    """Pallas-TPU equivalent of SmoothLoss().forward(input, output)."""
    N, C, H, W = inp.shape
    assert C == 3 and out.shape == inp.shape, "SmoothLoss expects matching (N, 3, H, W) tensors"
    assert H >= 3 and W >= 3, "2-pixel shifts require H, W >= 3"
    P = H * W                                   # flattened plane length (lane dim)
    L = 3 * P                                   # per-sample flat length (c, h, w order)
    SPAD = -(-(2 * W + 2) // 128) * 128         # zero front pad >= max shift, lane aligned
    PL = SPAD + P

    # Static (trace-time) constant tables.
    trco = jnp.asarray(_transform_coef_table(L))          # (1, 6, L)  f32
    wgts = jnp.asarray(_term_weight_table(H, W))          # (1, 12, P) f32

    # Lane-dense inputs:
    #  * raw input as per-sample flat rows, +/-2 zero-padded for the triple transform
    #  * output image as per-plane rows, front zero-padded for the shifted slices
    x_pad = jnp.pad(inp.astype(jnp.float32).reshape(N, 1, L), ((0, 0), (0, 0), (2, 2)))
    o_pad = jnp.pad(out.astype(jnp.float32).reshape(N, 3, P), ((0, 0), (0, 0), (SPAD, 0)))

    def kernel(xpad_ref, opad_ref, trco_ref, wgt_ref, part_ref, ycc_scr):
        # ---- fused rgb -> YCbCr (torch .view(-1,3).mm(mat)+bias), pure VPU FMAs ----
        x = xpad_ref[0]                          # (1, L + 4)
        tc = trco_ref[0]                         # (6, L)
        ycc = tc[0:1, :]                         # bias row
        for k in range(5):                       # neighbor offset d = k - 2
            ycc = ycc + tc[1 + k:2 + k, :] * x[:, k:k + L]

        # Scatter the three channel planes into a zero-front-padded VMEM scratch so
        # every shifted difference below is a static lane slice of a full-size buffer.
        # (Zero the pad region every step: scratch is uninitialized and, with a
        #  "parallel" batch grid, iteration 0 may not run on every core.)
        ycc_scr[:, :SPAD] = jnp.zeros((3, SPAD), jnp.float32)
        for c in range(3):
            ycc_scr[c:c + 1, SPAD:] = ycc[:, c * P:(c + 1) * P]

        yp = ycc_scr[...]                        # (3, SPAD + P)
        op = opad_ref[0]                         # (3, SPAD + P)
        y0 = yp[:, SPAD:]                        # (3, P) unshifted planes
        o0 = op[:, SPAD:]
        wt = wgt_ref[0]                          # (12, P)

        # ---- 12 unique shifted-difference terms, one full-size accumulator ----
        acc = jnp.zeros((1, P), jnp.float32)
        for t, (dh, dw) in enumerate(_PAIR_REPS):
            s = dh * W + dw                      # static flat shift (> 0 for all reps)
            dy = y0 - yp[:, SPAD - s:SPAD - s + P]
            do = o0 - op[:, SPAD - s:SPAD - s + P]
            w_t = jnp.exp(jnp.sum(dy * dy, axis=0, keepdims=True) * SIGMA_COLOR)
            g_t = jnp.sum(jnp.abs(do), axis=0, keepdims=True)
            acc = acc + wt[t:t + 1, :] * (w_t * g_t)

        part_ref[0] = jnp.sum(acc, keepdims=True)   # single final reduction per sample

    partials = pl.pallas_call(
        kernel,
        out_shape=jax.ShapeDtypeStruct((N, 1, 1), jnp.float32),
        grid=(N,),
        in_specs=[
            pl.BlockSpec((1, 1, L + 4), lambda n: (n, 0, 0)),
            pl.BlockSpec((1, 3, PL), lambda n: (n, 0, 0)),
            pl.BlockSpec((1, 6, L), lambda n: (0, 0, 0)),
            pl.BlockSpec((1, len(_PAIR_REPS), P), lambda n: (0, 0, 0)),
        ],
        out_specs=pl.BlockSpec((1, 1, 1), lambda n: (n, 0, 0)),
        scratch_shapes=[pltpu.VMEM((3, PL), jnp.float32)],
        compiler_params=pltpu.CompilerParams(
            dimension_semantics=("parallel",),
            vmem_limit_bytes=32 * 1024 * 1024,
        ),
    )(x_pad, o_pad, trco, wgts)

    # Each +/- pair contributes twice; torch's means also divide by the batch size.
    return 2.0 * jnp.sum(partials) / N


# ----------------------------- pure-JAX reference (sanity check) -------------------
def _shift_diff(x, dh, dw):
    H, W = x.shape[2], x.shape[3]
    r0, r1 = max(dh, 0), H + min(dh, 0)
    c0, c1 = max(dw, 0), W + min(dw, 0)
    return x[:, :, r0:r1, c0:c1] - x[:, :, r0 - dh:r1 - dh, c0 - dw:c1 - dw]


def smooth_loss_ref(inp, out):
    """Direct pure-JAX transcription of the torch module (all 24 terms)."""
    N, _, H, W = inp.shape
    flat = inp.astype(jnp.float32).reshape(-1, 3)
    mat = jnp.asarray(_MAT)
    bias = jnp.asarray(_BIAS)
    ycc = (flat[:, 0:1] * mat[0] + flat[:, 1:2] * mat[1] + flat[:, 2:3] * mat[2]
           + bias).reshape(N, 3, H, W)
    out = out.astype(jnp.float32)
    total = jnp.float32(0.0)
    for dh, dw in _OFFSETS_24:
        d_in = _shift_diff(ycc, dh, dw)
        w = jnp.exp(jnp.sum(d_in * d_in, axis=1, keepdims=True) * SIGMA_COLOR)
        g = jnp.sum(jnp.abs(_shift_diff(out, dh, dw)), axis=1, keepdims=True)
        total = total + jnp.mean(w * g)
    return total


if __name__ == "__main__":
    key = jax.random.PRNGKey(0)
    k1, k2 = jax.random.split(key)
    # input: RGB image batch (N, 3, H, W); output: enhanced image of the same shape.
    inp = jax.random.uniform(k1, (2, 3, 16, 16), dtype=jnp.float32)
    outp = jax.random.uniform(k2, (2, 3, 16, 16), dtype=jnp.float32)

    loss = jax.block_until_ready(jax.jit(smooth_loss)(inp, outp))
    ref = jax.block_until_ready(smooth_loss_ref(inp, outp))

    assert np.isfinite(float(loss)), loss
    assert np.allclose(float(loss), float(ref), rtol=1e-3, atol=1e-3), (float(loss), float(ref))
    print("KERNEL_OK")
</pallas_src>

<mosaic_0001>
module attributes {stable_mosaic.version = 11 : i64} {
  func.func @kernel(%arg0: i32, %arg1: memref<1x1x772xf32, #tpu.memory_space<vmem>>, %arg2: memref<1x3x384xf32, #tpu.memory_space<vmem>>, %arg3: memref<1x6x768xf32, #tpu.memory_space<vmem>>, %arg4: memref<1x12x256xf32, #tpu.memory_space<vmem>>, %arg5: memref<1x1x1xf32, #tpu.memory_space<vmem>>, %arg6: memref<3x384xf32, #tpu.memory_space<vmem>>) attributes {dimension_semantics = [#tpu.dimension_semantics<parallel>], iteration_bounds = array<i64: 2>, scalar_prefetch = 0 : i64, scratch_operands = 1 : i64, tpu.core_type = #tpu.core_type<tc>, window_params = [{transform_indices = @transform_0, window_bounds = array<i64: 1, 1, 772>}, {transform_indices = @transform_1, window_bounds = array<i64: 1, 3, 384>}, {pipeline_mode = #tpu.pipeline_mode<synchronous>, transform_indices = @transform_2, window_bounds = array<i64: 1, 6, 768>}, {pipeline_mode = #tpu.pipeline_mode<synchronous>, transform_indices = @transform_3, window_bounds = array<i64: 1, 12, 256>}, {transform_indices = @transform_4, window_bounds = array<i64: 1, 1, 1>}]} {
    %c0 = arith.constant 0 : index
    %c0_0 = arith.constant 0 : index
    %c0_1 = arith.constant 0 : index
    %0 = vector.load %arg1[%c0, %c0_0, %c0_1] : memref<1x1x772xf32, #tpu.memory_space<vmem>>, vector<1x1x772xf32>
    %1 = vector.shape_cast %0 : vector<1x1x772xf32> to vector<1x772xf32>
    %c0_2 = arith.constant 0 : index
    %c0_3 = arith.constant 0 : index
    %c0_4 = arith.constant 0 : index
    %2 = vector.load %arg3[%c0_2, %c0_3, %c0_4] : memref<1x6x768xf32, #tpu.memory_space<vmem>>, vector<1x6x768xf32>
    %3 = vector.shape_cast %2 : vector<1x6x768xf32> to vector<6x768xf32>
    %4 = vector.extract_strided_slice %3 {offsets = [0, 0], sizes = [1, 768], strides = [1, 1]} : vector<6x768xf32> to vector<1x768xf32>
    %5 = vector.extract_strided_slice %3 {offsets = [1, 0], sizes = [1, 768], strides = [1, 1]} : vector<6x768xf32> to vector<1x768xf32>
    %6 = vector.extract_strided_slice %1 {offsets = [0, 0], sizes = [1, 768], strides = [1, 1]} : vector<1x772xf32> to vector<1x768xf32>
    %7 = arith.mulf %5, %6 : vector<1x768xf32>
    %8 = arith.addf %4, %7 : vector<1x768xf32>
    %9 = vector.extract_strided_slice %3 {offsets = [2, 0], sizes = [1, 768], strides = [1, 1]} : vector<6x768xf32> to vector<1x768xf32>
    %10 = vector.extract_strided_slice %1 {offsets = [0, 1], sizes = [1, 768], strides = [1, 1]} : vector<1x772xf32> to vector<1x768xf32>
    %11 = arith.mulf %9, %10 : vector<1x768xf32>
    %12 = arith.addf %8, %11 : vector<1x768xf32>
    %13 = vector.extract_strided_slice %3 {offsets = [3, 0], sizes = [1, 768], strides = [1, 1]} : vector<6x768xf32> to vector<1x768xf32>
    %14 = vector.extract_strided_slice %1 {offsets = [0, 2], sizes = [1, 768], strides = [1, 1]} : vector<1x772xf32> to vector<1x768xf32>
    %15 = arith.mulf %13, %14 : vector<1x768xf32>
    %16 = arith.addf %12, %15 : vector<1x768xf32>
    %17 = vector.extract_strided_slice %3 {offsets = [4, 0], sizes = [1, 768], strides = [1, 1]} : vector<6x768xf32> to vector<1x768xf32>
    %18 = vector.extract_strided_slice %1 {offsets = [0, 3], sizes = [1, 768], strides = [1, 1]} : vector<1x772xf32> to vector<1x768xf32>
    %19 = arith.mulf %17, %18 : vector<1x768xf32>
    %20 = arith.addf %16, %19 : vector<1x768xf32>
    %21 = vector.extract_strided_slice %3 {offsets = [5, 0], sizes = [1, 768], strides = [1, 1]} : vector<6x768xf32> to vector<1x768xf32>
    %22 = vector.extract_strided_slice %1 {offsets = [0, 4], sizes = [1, 768], strides = [1, 1]} : vector<1x772xf32> to vector<1x768xf32>
    %23 = arith.mulf %21, %22 : vector<1x768xf32>
    %24 = arith.addf %20, %23 : vector<1x768xf32>
    %cst = arith.constant 0.000000e+00 : f32
    %25 = vector.broadcast %cst : f32 to vector<3x128xf32>
    %c0_5 = arith.constant 0 : index
    %c0_6 = arith.constant 0 : index
    %26 = vector.load %arg6[%c0_5, %c0_6] : memref<3x384xf32, #tpu.memory_space<vmem>>, vector<3x128xf32>
    tpu.vector_store %arg6[%c0_5, %c0_6], %25 {strides = array<i32>} : memref<3x384xf32, #tpu.memory_space<vmem>>, vector<3x128xf32>,
    %27 = vector.extract_strided_slice %24 {offsets = [0, 0], sizes = [1, 256], strides = [1, 1]} : vector<1x768xf32> to vector<1x256xf32>
    %c0_7 = arith.constant 0 : index
    %c128 = arith.constant 128 : index
    %28 = vector.load %arg6[%c0_7, %c128] : memref<3x384xf32, #tpu.memory_space<vmem>>, vector<1x256xf32>
    tpu.vector_store %arg6[%c0_7, %c128], %27 {strides = array<i32>} : memref<3x384xf32, #tpu.memory_space<vmem>>, vector<1x256xf32>,
    %29 = vector.extract_strided_slice %24 {offsets = [0, 256], sizes = [1, 256], strides = [1, 1]} : vector<1x768xf32> to vector<1x256xf32>
    %c1 = arith.constant 1 : index
    %c128_8 = arith.constant 128 : index
    %30 = vector.load %arg6[%c1, %c128_8] : memref<3x384xf32, #tpu.memory_space<vmem>>, vector<1x256xf32>
    tpu.vector_store %arg6[%c1, %c128_8], %29 {strides = array<i32>} : memref<3x384xf32, #tpu.memory_space<vmem>>, vector<1x256xf32>,
    %31 = vector.extract_strided_slice %24 {offsets = [0, 512], sizes = [1, 256], strides = [1, 1]} : vector<1x768xf32> to vector<1x256xf32>
    %c2 = arith.constant 2 : index
    %c128_9 = arith.constant 128 : index
    %32 = vector.load %arg6[%c2, %c128_9] : memref<3x384xf32, #tpu.memory_space<vmem>>, vector<1x256xf32>
    tpu.vector_store %arg6[%c2, %c128_9], %31 {strides = array<i32>} : memref<3x384xf32, #tpu.memory_space<vmem>>, vector<1x256xf32>,
    %c0_10 = arith.constant 0 : index
    %c0_11 = arith.constant 0 : index
    %33 = vector.load %arg6[%c0_10, %c0_11] : memref<3x384xf32, #tpu.memory_space<vmem>>, vector<3x384xf32>
    %c0_12 = arith.constant 0 : index
    %c0_13 = arith.constant 0 : index
    %c0_14 = arith.constant 0 : index
    %34 = vector.load %arg2[%c0_12, %c0_13, %c0_14] : memref<1x3x384xf32, #tpu.memory_space<vmem>>, vector<1x3x384xf32>
    %35 = vector.shape_cast %34 : vector<1x3x384xf32> to vector<3x384xf32>
    %36 = vector.extract_strided_slice %33 {offsets = [0, 128], sizes = [3, 256], strides = [1, 1]} : vector<3x384xf32> to vector<3x256xf32>
    %37 = vector.extract_strided_slice %35 {offsets = [0, 128], sizes = [3, 256], strides = [1, 1]} : vector<3x384xf32> to vector<3x256xf32>
    %c0_15 = arith.constant 0 : index
    %c0_16 = arith.constant 0 : index
    %c0_17 = arith.constant 0 : index
    %38 = vector.load %arg4[%c0_15, %c0_16, %c0_17] : memref<1x12x256xf32, #tpu.memory_space<vmem>>, vector<1x12x256xf32>
    %39 = vector.shape_cast %38 : vector<1x12x256xf32> to vector<12x256xf32>
    %cst_18 = arith.constant 0.000000e+00 : f32
    %40 = vector.broadcast %cst_18 : f32 to vector<1x256xf32>
    %41 = vector.extract_strided_slice %33 {offsets = [0, 112], sizes = [3, 256], strides = [1, 1]} : vector<3x384xf32> to vector<3x256xf32>
    %42 = arith.subf %36, %41 : vector<3x256xf32>
    %43 = vector.extract_strided_slice %35 {offsets = [0, 112], sizes = [3, 256], strides = [1, 1]} : vector<3x384xf32> to vector<3x256xf32>
    %44 = arith.subf %37, %43 : vector<3x256xf32>
    %45 = arith.mulf %42, %42 : vector<3x256xf32>
    %cst_19 = arith.constant dense<0.000000e+00> : vector<256xf32>
    %46 = vector.multi_reduction <add>, %45, %cst_19 [0] : vector<3x256xf32> to vector<256xf32>
    %47 = vector.shape_cast %46 : vector<256xf32> to vector<1x256xf32>
    %cst_20 = arith.constant -5.000000e-03 : f32
    %48 = vector.broadcast %cst_20 : f32 to vector<1x256xf32>
    %49 = arith.mulf %47, %48 : vector<1x256xf32>
    %50 = math.exp %49 : vector<1x256xf32>
    %51 = math.absf %44 : vector<3x256xf32>
    %cst_21 = arith.constant dense<0.000000e+00> : vector<256xf32>
    %52 = vector.multi_reduction <add>, %51, %cst_21 [0] : vector<3x256xf32> to vector<256xf32>
    %53 = vector.shape_cast %52 : vector<256xf32> to vector<1x256xf32>
    %54 = vector.extract_strided_slice %39 {offsets = [0, 0], sizes = [1, 256], strides = [1, 1]} : vector<12x256xf32> to vector<1x256xf32>
    %55 = arith.mulf %50, %53 : vector<1x256xf32>
    %56 = arith.mulf %54, %55 : vector<1x256xf32>
    %57 = arith.addf %40, %56 : vector<1x256xf32>
    %58 = vector.extract_strided_slice %33 {offsets = [0, 127], sizes = [3, 256], strides = [1, 1]} : vector<3x384xf32> to vector<3x256xf32>
    %59 = arith.subf %36, %58 : vector<3x256xf32>
    %60 = vector.extract_strided_slice %35 {offsets = [0, 127], sizes = [3, 256], strides = [1, 1]} : vector<3x384xf32> to vector<3x256xf32>
    %61 = arith.subf %37, %60 : vector<3x256xf32>
    %62 = arith.mulf %59, %59 : vector<3x256xf32>
    %cst_22 = arith.constant dense<0.000000e+00> : vector<256xf32>
    %63 = vector.multi_reduction <add>, %62, %cst_22 [0] : vector<3x256xf32> to vector<256xf32>
    %64 = vector.shape_cast %63 : vector<256xf32> to vector<1x256xf32>
    %cst_23 = arith.constant -5.000000e-03 : f32
    %65 = vector.broadcast %cst_23 : f32 to vector<1x256xf32>
    %66 = arith.mulf %64, %65 : vector<1x256xf32>
    %67 = math.exp %66 : vector<1x256xf32>
    %68 = math.absf %61 : vector<3x256xf32>
    %cst_24 = arith.constant dense<0.000000e+00> : vector<256xf32>
    %69 = vector.multi_reduction <add>, %68, %cst_24 [0] : vector<3x256xf32> to vector<256xf32>
    %70 = vector.shape_cast %69 : vector<256xf32> to vector<1x256xf32>
    %71 = vector.extract_strided_slice %39 {offsets = [1, 0], sizes = [1, 256], strides = [1, 1]} : vector<12x256xf32> to vector<1x256xf32>
    %72 = arith.mulf %67, %70 : vector<1x256xf32>
    %73 = arith.mulf %71, %72 : vector<1x256xf32>
    %74 = arith.addf %57, %73 : vector<1x256xf32>
    %75 = vector.extract_strided_slice %33 {offsets = [0, 111], sizes = [3, 256], strides = [1, 1]} : vector<3x384xf32> to vector<3x256xf32>
    %76 = arith.subf %36, %75 : vector<3x256xf32>
    %77 = vector.extract_strided_slice %35 {offsets = [0, 111], sizes = [3, 256], strides = [1, 1]} : vector<3x384xf32> to vector<3x256xf32>
    %78 = arith.subf %37, %77 : vector<3x256xf32>
    %79 = arith.mulf %76, %76 : vector<3x256xf32>
    %cst_25 = arith.constant dense<0.000000e+00> : vector<256xf32>
    %80 = vector.multi_reduction <add>, %79, %cst_25 [0] : vector<3x256xf32> to vector<256xf32>
    %81 = vector.shape_cast %80 : vector<256xf32> to vector<1x256xf32>
    %cst_26 = arith.constant -5.000000e-03 : f32
    %82 = vector.broadcast %cst_26 : f32 to vector<1x256xf32>
    %83 = arith.mulf %81, %82 : vector<1x256xf32>
    %84 = math.exp %83 : vector<1x256xf32>
    %85 = math.absf %78 : vector<3x256xf32>
    %cst_27 = arith.constant dense<0.000000e+00> : vector<256xf32>
    %86 = vector.multi_reduction <add>, %85, %cst_27 [0] : vector<3x256xf32> to vector<256xf32>
    %87 = vector.shape_cast %86 : vector<256xf32> to vector<1x256xf32>
    %88 = vector.extract_strided_slice %39 {offsets = [2, 0], sizes = [1, 256], strides = [1, 1]} : vector<12x256xf32> to vector<1x256xf32>
    %89 = arith.mulf %84, %87 : vector<1x256xf32>
    %90 = arith.mulf %88, %89 : vector<1x256xf32>
    %91 = arith.addf %74, %90 : vector<1x256xf32>
    %92 = vector.extract_strided_slice %33 {offsets = [0, 113], sizes = [3, 256], strides = [1, 1]} : vector<3x384xf32> to vector<3x256xf32>
    %93 = arith.subf %36, %92 : vector<3x256xf32>
    %94 = vector.extract_strided_slice %35 {offsets = [0, 113], sizes = [3, 256], strides = [1, 1]} : vector<3x384xf32> to vector<3x256xf32>
    %95 = arith.subf %37, %94 : vector<3x256xf32>
    %96 = arith.mulf %93, %93 : vector<3x256xf32>
    %cst_28 = arith.constant dense<0.000000e+00> : vector<256xf32>
    %97 = vector.multi_reduction <add>, %96, %cst_28 [0] : vector<3x256xf32> to vector<256xf32>
    %98 = vector.shape_cast %97 : vector<256xf32> to vector<1x256xf32>
    %cst_29 = arith.constant -5.000000e-03 : f32
    %99 = vector.broadcast %cst_29 : f32 to vector<1x256xf32>
    %100 = arith.mulf %98, %99 : vector<1x256xf32>
    %101 = math.exp %100 : vector<1x256xf32>
    %102 = math.absf %95 : vector<3x256xf32>
    %cst_30 = arith.constant dense<0.000000e+00> : vector<256xf32>
    %103 = vector.multi_reduction <add>, %102, %cst_30 [0] : vector<3x256xf32> to vector<256xf32>
    %104 = vector.shape_cast %103 : vector<256xf32> to vector<1x256xf32>
    %105 = vector.extract_strided_slice %39 {offsets = [3, 0], sizes = [1, 256], strides = [1, 1]} : vector<12x256xf32> to vector<1x256xf32>
    %106 = arith.mulf %101, %104 : vector<1x256xf32>
    %107 = arith.mulf %105, %106 : vector<1x256xf32>
    %108 = arith.addf %91, %107 : vector<1x256xf32>
    %109 = vector.extract_strided_slice %33 {offsets = [0, 96], sizes = [3, 256], strides = [1, 1]} : vector<3x384xf32> to vector<3x256xf32>
    %110 = arith.subf %36, %109 : vector<3x256xf32>
    %111 = vector.extract_strided_slice %35 {offsets = [0, 96], sizes = [3, 256], strides = [1, 1]} : vector<3x384xf32> to vector<3x256xf32>
    %112 = arith.subf %37, %111 : vector<3x256xf32>
    %113 = arith.mulf %110, %110 : vector<3x256xf32>
    %cst_31 = arith.constant dense<0.000000e+00> : vector<256xf32>
    %114 = vector.multi_reduction <add>, %113, %cst_31 [0] : vector<3x256xf32> to vector<256xf32>
    %115 = vector.shape_cast %114 : vector<256xf32> to vector<1x256xf32>
    %cst_32 = arith.constant -5.000000e-03 : f32
    %116 = vector.broadcast %cst_32 : f32 to vector<1x256xf32>
    %117 = arith.mulf %115, %116 : vector<1x256xf32>
    %118 = math.exp %117 : vector<1x256xf32>
    %119 = math.absf %112 : vector<3x256xf32>
    %cst_33 = arith.constant dense<0.000000e+00> : vector<256xf32>
    %120 = vector.multi_reduction <add>, %119, %cst_33 [0] : vector<3x256xf32> to vector<256xf32>
    %121 = vector.shape_cast %120 : vector<256xf32> to vector<1x256xf32>
    %122 = vector.extract_strided_slice %39 {offsets = [4, 0], sizes = [1, 256], strides = [1, 1]} : vector<12x256xf32> to vector<1x256xf32>
    %123 = arith.mulf %118, %121 : vector<1x256xf32>
    %124 = arith.mulf %122, %123 : vector<1x256xf32>
    %125 = arith.addf %108, %124 : vector<1x256xf32>
    %126 = vector.extract_strided_slice %33 {offsets = [0, 126], sizes = [3, 256], strides = [1, 1]} : vector<3x384xf32> to vector<3x256xf32>
    %127 = arith.subf %36, %126 : vector<3x256xf32>
    %128 = vector.extract_strided_slice %35 {offsets = [0, 126], sizes = [3, 256], strides = [1, 1]} : vector<3x384xf32> to vector<3x256xf32>
    %129 = arith.subf %37, %128 : vector<3x256xf32>
    %130 = arith.mulf %127, %127 : vector<3x256xf32>
    %cst_34 = arith.constant dense<0.000000e+00> : vector<256xf32>
    %131 = vector.multi_reduction <add>, %130, %cst_34 [0] : vector<3x256xf32> to vector<256xf32>
    %132 = vector.shape_cast %131 : vector<256xf32> to vector<1x256xf32>
    %cst_35 = arith.constant -5.000000e-03 : f32
    %133 = vector.broadcast %cst_35 : f32 to vector<1x256xf32>
    %134 = arith.mulf %132, %133 : vector<1x256xf32>
    %135 = math.exp %134 : vector<1x256xf32>
    %136 = math.absf %129 : vector<3x256xf32>
    %cst_36 = arith.constant dense<0.000000e+00> : vector<256xf32>
    %137 = vector.multi_reduction <add>, %136, %cst_36 [0] : vector<3x256xf32> to vector<256xf32>
    %138 = vector.shape_cast %137 : vector<256xf32> to vector<1x256xf32>
    %139 = vector.extract_strided_slice %39 {offsets = [5, 0], sizes = [1, 256], strides = [1, 1]} : vector<12x256xf32> to vector<1x256xf32>
    %140 = arith.mulf %135, %138 : vector<1x256xf32>
    %141 = arith.mulf %139, %140 : vector<1x256xf32>
    %142 = arith.addf %125, %141 : vector<1x256xf32>
    %143 = vector.extract_strided_slice %33 {offsets = [0, 95], sizes = [3, 256], strides = [1, 1]} : vector<3x384xf32> to vector<3x256xf32>
    %144 = arith.subf %36, %143 : vector<3x256xf32>
    %145 = vector.extract_strided_slice %35 {offsets = [0, 95], sizes = [3, 256], strides = [1, 1]} : vector<3x384xf32> to vector<3x256xf32>
    %146 = arith.subf %37, %145 : vector<3x256xf32>
    %147 = arith.mulf %144, %144 : vector<3x256xf32>
    %cst_37 = arith.constant dense<0.000000e+00> : vector<256xf32>
    %148 = vector.multi_reduction <add>, %147, %cst_37 [0] : vector<3x256xf32> to vector<256xf32>
    %149 = vector.shape_cast %148 : vector<256xf32> to vector<1x256xf32>
    %cst_38 = arith.constant -5.000000e-03 : f32
    %150 = vector.broadcast %cst_38 : f32 to vector<1x256xf32>
    %151 = arith.mulf %149, %150 : vector<1x256xf32>
    %152 = math.exp %151 : vector<1x256xf32>
    %153 = math.absf %146 : vector<3x256xf32>
    %cst_39 = arith.constant dense<0.000000e+00> : vector<256xf32>
    %154 = vector.multi_reduction <add>, %153, %cst_39 [0] : vector<3x256xf32> to vector<256xf32>
    %155 = vector.shape_cast %154 : vector<256xf32> to vector<1x256xf32>
    %156 = vector.extract_strided_slice %39 {offsets = [6, 0], sizes = [1, 256], strides = [1, 1]} : vector<12x256xf32> to vector<1x256xf32>
    %157 = arith.mulf %152, %155 : vector<1x256xf32>
    %158 = arith.mulf %156, %157 : vector<1x256xf32>
    %159 = arith.addf %142, %158 : vector<1x256xf32>
    %160 = vector.extract_strided_slice %33 {offsets = [0, 97], sizes = [3, 256], strides = [1, 1]} : vector<3x384xf32> to vector<3x256xf32>
    %161 = arith.subf %36, %160 : vector<3x256xf32>
    %162 = vector.extract_strided_slice %35 {offsets = [0, 97], sizes = [3, 256], strides = [1, 1]} : vector<3x384xf32> to vector<3x256xf32>
    %163 = arith.subf %37, %162 : vector<3x256xf32>
    %164 = arith.mulf %161, %161 : vector<3x256xf32>
    %cst_40 = arith.constant dense<0.000000e+00> : vector<256xf32>
    %165 = vector.multi_reduction <add>, %164, %cst_40 [0] : vector<3x256xf32> to vector<256xf32>
    %166 = vector.shape_cast %165 : vector<256xf32> to vector<1x256xf32>
    %cst_41 = arith.constant -5.000000e-03 : f32
    %167 = vector.broadcast %cst_41 : f32 to vector<1x256xf32>
    %168 = arith.mulf %166, %167 : vector<1x256xf32>
    %169 = math.exp %168 : vector<1x256xf32>
    %170 = math.absf %163 : vector<3x256xf32>
    %cst_42 = arith.constant dense<0.000000e+00> : vector<256xf32>
    %171 = vector.multi_reduction <add>, %170, %cst_42 [0] : vector<3x256xf32> to vector<256xf32>
    %172 = vector.shape_cast %171 : vector<256xf32> to vector<1x256xf32>
    %173 = vector.extract_strided_slice %39 {offsets = [7, 0], sizes = [1, 256], strides = [1, 1]} : vector<12x256xf32> to vector<1x256xf32>
    %174 = arith.mulf %169, %172 : vector<1x256xf32>
    %175 = arith.mulf %173, %174 : vector<1x256xf32>
    %176 = arith.addf %159, %175 : vector<1x256xf32>
    %177 = vector.extract_strided_slice %33 {offsets = [0, 110], sizes = [3, 256], strides = [1, 1]} : vector<3x384xf32> to vector<3x256xf32>
    %178 = arith.subf %36, %177 : vector<3x256xf32>
    %179 = vector.extract_strided_slice %35 {offsets = [0, 110], sizes = [3, 256], strides = [1, 1]} : vector<3x384xf32> to vector<3x256xf32>
    %180 = arith.subf %37, %179 : vector<3x256xf32>
    %181 = arith.mulf %178, %178 : vector<3x256xf32>
    %cst_43 = arith.constant dense<0.000000e+00> : vector<256xf32>
    %182 = vector.multi_reduction <add>, %181, %cst_43 [0] : vector<3x256xf32> to vector<256xf32>
    %183 = vector.shape_cast %182 : vector<256xf32> to vector<1x256xf32>
    %cst_44 = arith.constant -5.000000e-03 : f32
    %184 = vector.broadcast %cst_44 : f32 to vector<1x256xf32>
    %185 = arith.mulf %183, %184 : vector<1x256xf32>
    %186 = math.exp %185 : vector<1x256xf32>
    %187 = math.absf %180 : vector<3x256xf32>
    %cst_45 = arith.constant dense<0.000000e+00> : vector<256xf32>
    %188 = vector.multi_reduction <add>, %187, %cst_45 [0] : vector<3x256xf32> to vector<256xf32>
    %189 = vector.shape_cast %188 : vector<256xf32> to vector<1x256xf32>
    %190 = vector.extract_strided_slice %39 {offsets = [8, 0], sizes = [1, 256], strides = [1, 1]} : vector<12x256xf32> to vector<1x256xf32>
    %191 = arith.mulf %186, %189 : vector<1x256xf32>
    %192 = arith.mulf %190, %191 : vector<1x256xf32>
    %193 = arith.addf %176, %192 : vector<1x256xf32>
    %194 = vector.extract_strided_slice %33 {offsets = [0, 114], sizes = [3, 256], strides = [1, 1]} : vector<3x384xf32> to vector<3x256xf32>
    %195 = arith.subf %36, %194 : vector<3x256xf32>
    %196 = vector.extract_strided_slice %35 {offsets = [0, 114], sizes = [3, 256], strides = [1, 1]} : vector<3x384xf32> to vector<3x256xf32>
    %197 = arith.subf %37, %196 : vector<3x256xf32>
    %198 = arith.mulf %195, %195 : vector<3x256xf32>
    %cst_46 = arith.constant dense<0.000000e+00> : vector<256xf32>
    %199 = vector.multi_reduction <add>, %198, %cst_46 [0] : vector<3x256xf32> to vector<256xf32>
    %200 = vector.shape_cast %199 : vector<256xf32> to vector<1x256xf32>
    %cst_47 = arith.constant -5.000000e-03 : f32
    %201 = vector.broadcast %cst_47 : f32 to vector<1x256xf32>
    %202 = arith.mulf %200, %201 : vector<1x256xf32>
    %203 = math.exp %202 : vector<1x256xf32>
    %204 = math.absf %197 : vector<3x256xf32>
    %cst_48 = arith.constant dense<0.000000e+00> : vector<256xf32>
    %205 = vector.multi_reduction <add>, %204, %cst_48 [0] : vector<3x256xf32> to vector<256xf32>
    %206 = vector.shape_cast %205 : vector<256xf32> to vector<1x256xf32>
    %207 = vector.extract_strided_slice %39 {offsets = [9, 0], sizes = [1, 256], strides = [1, 1]} : vector<12x256xf32> to vector<1x256xf32>
    %208 = arith.mulf %203, %206 : vector<1x256xf32>
    %209 = arith.mulf %207, %208 : vector<1x256xf32>
    %210 = arith.addf %193, %209 : vector<1x256xf32>
    %211 = vector.extract_strided_slice %33 {offsets = [0, 94], sizes = [3, 256], strides = [1, 1]} : vector<3x384xf32> to vector<3x256xf32>
    %212 = arith.subf %36, %211 : vector<3x256xf32>
    %213 = vector.extract_strided_slice %35 {offsets = [0, 94], sizes = [3, 256], strides = [1, 1]} : vector<3x384xf32> to vector<3x256xf32>
    %214 = arith.subf %37, %213 : vector<3x256xf32>
    %215 = arith.mulf %212, %212 : vector<3x256xf32>
    %cst_49 = arith.constant dense<0.000000e+00> : vector<256xf32>
    %216 = vector.multi_reduction <add>, %215, %cst_49 [0] : vector<3x256xf32> to vector<256xf32>
    %217 = vector.shape_cast %216 : vector<256xf32> to vector<1x256xf32>
    %cst_50 = arith.constant -5.000000e-03 : f32
    %218 = vector.broadcast %cst_50 : f32 to vector<1x256xf32>
    %219 = arith.mulf %217, %218 : vector<1x256xf32>
    %220 = math.exp %219 : vector<1x256xf32>
    %221 = math.absf %214 : vector<3x256xf32>
    %cst_51 = arith.constant dense<0.000000e+00> : vector<256xf32>
    %222 = vector.multi_reduction <add>, %221, %cst_51 [0] : vector<3x256xf32> to vector<256xf32>
    %223 = vector.shape_cast %222 : vector<256xf32> to vector<1x256xf32>
    %224 = vector.extract_strided_slice %39 {offsets = [10, 0], sizes = [1, 256], strides = [1, 1]} : vector<12x256xf32> to vector<1x256xf32>
    %225 = arith.mulf %220, %223 : vector<1x256xf32>
    %226 = arith.mulf %224, %225 : vector<1x256xf32>
    %227 = arith.addf %210, %226 : vector<1x256xf32>
    %228 = vector.extract_strided_slice %33 {offsets = [0, 98], sizes = [3, 256], strides = [1, 1]} : vector<3x384xf32> to vector<3x256xf32>
    %229 = arith.subf %36, %228 : vector<3x256xf32>
    %230 = vector.extract_strided_slice %35 {offsets = [0, 98], sizes = [3, 256], strides = [1, 1]} : vector<3x384xf32> to vector<3x256xf32>
    %231 = arith.subf %37, %230 : vector<3x256xf32>
    %232 = arith.mulf %229, %229 : vector<3x256xf32>
    %cst_52 = arith.constant dense<0.000000e+00> : vector<256xf32>
    %233 = vector.multi_reduction <add>, %232, %cst_52 [0] : vector<3x256xf32> to vector<256xf32>
    %234 = vector.shape_cast %233 : vector<256xf32> to vector<1x256xf32>
    %cst_53 = arith.constant -5.000000e-03 : f32
    %235 = vector.broadcast %cst_53 : f32 to vector<1x256xf32>
    %236 = arith.mulf %234, %235 : vector<1x256xf32>
    %237 = math.exp %236 : vector<1x256xf32>
    %238 = math.absf %231 : vector<3x256xf32>
    %cst_54 = arith.constant dense<0.000000e+00> : vector<256xf32>
    %239 = vector.multi_reduction <add>, %238, %cst_54 [0] : vector<3x256xf32> to vector<256xf32>
    %240 = vector.shape_cast %239 : vector<256xf32> to vector<1x256xf32>
    %241 = vector.extract_strided_slice %39 {offsets = [11, 0], sizes = [1, 256], strides = [1, 1]} : vector<12x256xf32> to vector<1x256xf32>
    %242 = arith.mulf %237, %240 : vector<1x256xf32>
    %243 = arith.mulf %241, %242 : vector<1x256xf32>
    %244 = arith.addf %227, %243 : vector<1x256xf32>
    %245 = vector.shape_cast %244 : vector<1x256xf32> to vector<1x1x256xf32>
    %cst_55 = arith.constant dense<0.000000e+00> : vector<1xf32>
    %246 = vector.multi_reduction <add>, %245, %cst_55 [1, 2] : vector<1x1x256xf32> to vector<1xf32>
    %247 = vector.shape_cast %246 : vector<1xf32> to vector<1x1x1xf32>
    %248 = vector.extract %247[0, 0, 0] : f32 from vector<1x1x1xf32>
    %249 = vector.broadcast %248 : f32 to vector<1x1xf32>
    %c0_56 = arith.constant 0 : index
    %c0_57 = arith.constant 0 : index
    %c0_58 = arith.constant 0 : index
    %250 = vector.load %arg5[%c0_56, %c0_57, %c0_58] : memref<1x1x1xf32, #tpu.memory_space<vmem>>, vector<1x1x1xf32>
    %251 = vector.shape_cast %250 : vector<1x1x1xf32> to vector<1x1xf32>
    %252 = vector.shape_cast %249 : vector<1x1xf32> to vector<1x1x1xf32>
    tpu.vector_store %arg5[%c0_56, %c0_57, %c0_58], %252 {strides = array<i32>} : memref<1x1x1xf32, #tpu.memory_space<vmem>>, vector<1x1x1xf32>,
    return
  }
  func.func @transform_0(%arg0: i32) -> (i32, i32, i32) {
    %c0_i32 = arith.constant 0 : i32
    %c0_i32_0 = arith.constant 0 : i32
    %c0_i32_1 = arith.constant 0 : i32
    return %arg0, %c0_i32, %c0_i32_0 : i32, i32, i32
  }
  func.func @transform_1(%arg0: i32) -> (i32, i32, i32) {
    %c0_i32 = arith.constant 0 : i32
    %c0_i32_0 = arith.constant 0 : i32
    %c0_i32_1 = arith.constant 0 : i32
    return %arg0, %c0_i32, %c0_i32_0 : i32, i32, i32
  }
  func.func @transform_2(%arg0: i32) -> (i32, i32, i32) {
    %c0_i32 = arith.constant 0 : i32
    %c0_i32_0 = arith.constant 0 : i32
    %c0_i32_1 = arith.constant 0 : i32
    %c0_i32_2 = arith.constant 0 : i32
    return %c0_i32, %c0_i32_0, %c0_i32_1 : i32, i32, i32
  }
  func.func @transform_3(%arg0: i32) -> (i32, i32, i32) {
    %c0_i32 = arith.constant 0 : i32
    %c0_i32_0 = arith.constant 0 : i32
    %c0_i32_1 = arith.constant 0 : i32
    %c0_i32_2 = arith.constant 0 : i32
    return %c0_i32, %c0_i32_0, %c0_i32_1 : i32, i32, i32
  }
  func.func @transform_4(%arg0: i32) -> (i32, i32, i32) {
    %c0_i32 = arith.constant 0 : i32
    %c0_i32_0 = arith.constant 0 : i32
    %c0_i32_1 = arith.constant 0 : i32
    return %arg0, %c0_i32, %c0_i32_0 : i32, i32, i32
  }
}

</mosaic_0001>

<bundles_post_ra>
// kernel: smooth_loss.1
= control target key start
LH: loop header
LB: loop body
LE: loop exit
PB: predicated region body
PF: predicated region fallthrough
CT: control target
= control target key end

     0   :  { %s1698_s15 = smov 0   ;;  %s2264_s0 = inlined_call_operand.vmem [shape: f32[2,1,772], index: 0, kind: input, shape index: {}]   ;;  %s2265_s1 = inlined_call_operand.vmem [shape: f32[2,3,384], index: 1, kind: input, shape index: {}]   ;;  %s2266_s2 = inlined_call_operand.vmem [shape: f32[1,6,768], index: 2, kind: input, shape index: {}]   ;;  %s2267_s3 = inlined_call_operand.vmem [shape: f32[1,12,256], index: 3, kind: input, shape index: {}]   ;;  %s2268_s4 = inlined_call_operand.vmem [shape: f32[2,1,1], index: 4, kind: output, shape index: {}]  }
   0x1 LB: > { %s1561_s16 = sadd.s32 4294967295, %s1653_s15   ;;  %p1565_p0 = scmp.ge.s32.totalorder %s1653_s15, 1  ;;  %s1653_s15 = sphi %s1698_s15, %s14_s15  }
   0x2   : > { %p171_p1 = scmp.lt.s32.totalorder %s1653_s15, 3 }
   0x4   : > { %p172_p2 = pnand %p1565_p0, %p171_p1 }
   0x5   : > { %p199_p3 = scmp.lt.s32.totalorder (!%p172_p2), %s1561_s16, 1  ;;  %v219_v0 = vlaneseq (!%p172_p2)  ;;  %s1655_s21 = smov (!%p172_p2), 127   ;;  %v1659_v19 = vmov (!%p172_p2), 0.0   ;;  %v1801_v30 = vld [vmem:[%s2266_s2 + $0x10] sm:$0x3f] (!%p172_p2)  ;;  %vm297_vm0 = vcmask (!%p172_p2), 1039360  }
   0x6   : > { %175 = sbr.rel (%p172_p2) target bundleno = 670 (0x29e), region = 36  ;;  %s1656_s22 = smov (!%p172_p2), 126   ;;  %511 = vst [vmem:[#allocation2] sm:$0x7] (!%p172_p2), %v1659_v19  ;;  %v1806_v31 = vld [vmem:[%s2266_s2] sm:$0x3f] (!%p172_p2) }
   0x7   : > { %v1709_v1 = vshrl.u32 (!%p172_p2), %v219_v0, 7  ;;  %s1657_s23 = smov (!%p172_p2), 125   ;;  %s1658_s24 = smov (!%p172_p2), 124   ;;  %v1811_v32 = vld [vmem:[%s2266_s2 + $0x8] sm:$0x3f] (!%p172_p2)  ;;  %vm354_vm1 = vcmask (!%p172_p2), 1031168  }
   0x8   : > { %s1660_s29 = smov (!%p172_p2), 1   ;;  %s1661_s30 = smov (!%p172_p2), 16   ;;  %v1818_v35 = vld [vmem:[%s2266_s2 + $0x18] sm:$0x3f] (!%p172_p2)  ;;  %v1823_v36 = vld [vmem:[%s2266_s2 + $0x20] sm:$0x3f] (!%p172_p2) }
   0x9   : > { %v229_v2 = vsub.s32 (!%p172_p2), 2, %v1709_v1  ;;  %v221_v3 = vsub.s32 (!%p172_p2), 0, %v1709_v1  ;;  %v233_v4 = vsub.s32 (!%p172_p2), 3, %v1709_v1  ;;  %v225_v5 = vsub.s32 (!%p172_p2), 1, %v1709_v1  ;;  %s1662_s5 = smov (!%p172_p2), 17   ;;  %s1663_s6 = smov (!%p172_p2), 15  }
   0xa   : > { %v241_v11 = vsub.s32 (!%p172_p2), 5, %v1709_v1  ;;  %v237_v12 = vsub.s32 (!%p172_p2), 4, %v1709_v1  ;;  %v281_v15 = vsub.s32 (!%p172_p2), 6, %v1709_v1  ;;  %s1664_s7 = smov (!%p172_p2), 32   ;;  %s1665_s8 = smov (!%p172_p2), 2   ;;  %vm411_vm2 = vcmask (!%p172_p2), 1022976  }
   0xb   : > { %s1666_s9 = smov (!%p172_p2), 33   ;;  %s1667_s10 = smov (!%p172_p2), 31   ;;  %v1834_v40 = vld [vmem:[%s2266_s2 + $0x28] sm:$0x3f] (!%p172_p2)  ;;  %v1668_v58 = vmov (!%p172_p2), 1966171168  }
   0xc   : > { %v516_v59 = vunpack.c.l.s4 (!%p172_p2), %v1668_v58  ;;  %vm468_vm3 = vcmask (!%p172_p2), 1014784   ;;  %vm1912_vm4 = vcmp.lt.s32.totalorder (!%p172_p2), %v219_v0, 256  ;;  %vm674_vm5 = vcmask (!%p172_p2), 7168   ;;  %s1670_s26 = smov (!%p172_p2), 14   ;;  %s1671_s27 = smov (!%p172_p2), 34  }
   0xd   : > { %s2272_s16 = smov (!%p199_p3, %s1561_s16), 1  ;;  %vm588_vm6 = vcmask 1043456   ;;  %vm598_vm7 = vcmask 130048   ;;  %vm749_vm8 = vcmask 138240   ;;  %vm824_vm9 = vcmask 121856  }
   0xe   : > { %s1569_s17 = smul.u32 7, %s2272_s16  ;;  %vm899_vm10 = vcmask 261120   ;;  %vm622_vm11 = vcmask 1042432   ;;  %vm974_vm12 = vcmask 15360   ;;  %vm1049_vm13 = vcmask 269312   ;;  %s210_s13 = scalar_lea.vmem %s2268_s4, %s2272_s16 }
   0xf   : > { %s1570_s25 = smul.u32 12, %s2272_s16  ;;  %vm1124_vm14 = vcmask 252928   ;;  %vm1199_vm15 = vcmask 146432  }
  0x10   : > { %s202_s20 = scalar_lea.vmem %s2264_s0, %s1569_s17 }
  0x11   : > { %v211_v6 = vld [vmem:[%s202_s20] sm:$0x7f]  ;;  %s207_s28 = scalar_lea.vmem %s2265_s1, %s1570_s25  ;;  %s1669_s25 = smov 18  }
  0x12   : > { %v1719_v7 = vrot.slane %v211_v6, %v229_v2  ;;  %v1721_v8 = vrot.slane %v211_v6, %v221_v3  ;;  %v1725_v9 = vrot.slane %v211_v6, %v233_v4  ;;  %v1727_v10 = vrot.slane %v211_v6, %v225_v5  ;;  %v1762_v17 = vld [vmem:[%s207_s28] sm:$0x77]  ;;  %v1764_v18 = vld [vmem:[%s207_s28 + $0x8] sm:$0x7]  ;;  %s1672_s28 = smov 30  }
  0x13   : > { %v1733_v13 = vrot.slane %v211_v6, %v241_v11  ;;  %v1735_v14 = vrot.slane %v211_v6, %v237_v12  ;;  %v282_v16 = vrot.slane %v211_v6, %v281_v15 }
  0x14   : > { %287 = vrot.lane.b32.xlu1 %v1719_v7, %s1655_s21  ;;  %283 = vrot.lane.b32.xlu0 %v1721_v8, %s1655_s21  ;;  %v251_v37 = vmul.f32 %v1719_v7, %v1801_v30  ;;  %v250_v38 = vmul.f32 %v1727_v10, %v1811_v32  ;;  %v249_v39 = vmul.f32 %v1721_v8, %v1806_v31 }
  0x15   : > { %v252_v41 = vmul.f32 %v1725_v9, %v1818_v35  ;;  %v253_v44 = vmul.f32 %v1735_v14, %v1823_v36  ;;  %v254_v45 = vmul.f32 %v1733_v13, %v1834_v40 }
  0x16   : > { %v263_v46 = vrot.slane %v251_v37, 1  ;;  %v262_v47 = vrot.slane %v250_v38, 1  ;;  %v261_v48 = vrot.slane %v249_v39, 1 }
  0x17   : > { %v264_v49 = vrot.slane %v252_v41, 1  ;;  %v265_v54 = vrot.slane %v253_v44, 1  ;;  %v266_v57 = vrot.slane %v254_v45, 1 }
  0x18   : > { %289 = vrot.lane.b32.xlu1 %v1725_v9, %s1655_s21  ;;  %285 = vrot.lane.b32.xlu0 %v1727_v10, %s1655_s21  ;;  %v275_v60 = vadd.f32 %v263_v46, %v1801_v30  ;;  %v274_v61 = vadd.f32 %v262_v47, %v1811_v32  ;;  %v273_v62 = vadd.f32 %v261_v48, %v1806_v31 }
  0x19   : > { %v277_v11 = vadd.f32 %v265_v54, %v1823_v36 }
  0x1c   : > { %293 = vrot.lane.b32.xlu1 %v1733_v13, %s1655_s21  ;;  %291 = vrot.lane.b32.xlu0 %v1735_v14, %s1655_s21 }
  0x20   : > { %340 = vrot.lane.b32.xlu1 %v1721_v8, %s1656_s22  ;;  %295 = vrot.lane.b32.xlu0 %v282_v16, %s1655_s21 }
  0x24   : > { %344 = vrot.lane.b32.xlu1 %v1719_v7, %s1656_s22  ;;  %342 = vrot.lane.b32.xlu0 %v1727_v10, %s1656_s22 }
  0x28   : > { %348 = vrot.lane.b32.xlu1 %v1735_v14, %s1656_s22  ;;  %346 = vrot.lane.b32.xlu0 %v1725_v9, %s1656_s22 }
  0x2c   : > { %352 = vrot.lane.b32.xlu1 %v282_v16, %s1656_s22  ;;  %350 = vrot.lane.b32.xlu0 %v1733_v13, %s1656_s22 }
  0x30   : > { %399 = vrot.lane.b32.xlu1 %v1727_v10, %s1657_s23  ;;  %397 = vrot.lane.b32.xlu0 %v1721_v8, %s1657_s23 }
  0x34   : > { %403 = vrot.lane.b32.xlu1 %v1725_v9, %s1657_s23  ;;  %401 = vrot.lane.b32.xlu0 %v1719_v7, %s1657_s23 }
  0x38   : > { %407 = vrot.lane.b32.xlu1 %v1733_v13, %s1657_s23  ;;  %405 = vrot.lane.b32.xlu0 %v1735_v14, %s1657_s23 }
  0x3c   : > { %454 = vrot.lane.b32.xlu1 %v1721_v8, %s1658_s24  ;;  %409 = vrot.lane.b32.xlu0 %v282_v16, %s1657_s23 }
  0x40   : > { %458 = vrot.lane.b32.xlu1 %v1719_v7, %s1658_s24  ;;  %456 = vrot.lane.b32.xlu0 %v1727_v10, %s1658_s24 }
  0x44   : > { %462 = vrot.lane.b32.xlu1 %v1735_v14, %s1658_s24  ;;  %460 = vrot.lane.b32.xlu0 %v1725_v9, %s1658_s24  ;;  %v276_v9 = vadd.f32 %v264_v49, %v1818_v35  ;;  %v517_v14 = vunpack.c.0.s8 %v516_v59 }
  0x46   : > { %v1879_v46 = vsub.s32 %v517_v14, %v1709_v1 }
  0x48   : > { %466 = vrot.lane.b32.xlu1 %v282_v16, %s1658_s24  ;;  %464 = vrot.lane.b32.xlu0 %v1733_v13, %s1658_s24 }
  0x4c   : > { %680 = vrot.lane.b32.xlu1 %v1764_v18, %s1660_s29  ;;  %678 = vrot.lane.b32.xlu0 %v1762_v17, %s1660_s29 }
  0x50   : > { %610 = vrot.lane.b32.xlu1 %v1764_v18, %s1661_s30  ;;  %608 = vrot.lane.b32.xlu0 %v1762_v17, %s1661_s30 }
  0x54   : > { %755 = vrot.lane.b32.xlu1 %v1764_v18, %s1662_s5  ;;  %753 = vrot.lane.b32.xlu0 %v1762_v17, %s1662_s5 }
  0x58   : > { %830 = vrot.lane.b32.xlu1 %v1764_v18, %s1663_s6  ;;  %828 = vrot.lane.b32.xlu0 %v1762_v17, %s1663_s6 }
  0x5c   : > { %905 = vrot.lane.b32.xlu1 %v1764_v18, %s1664_s7  ;;  %903 = vrot.lane.b32.xlu0 %v1762_v17, %s1664_s7 }
  0x60   : > { %980 = vrot.lane.b32.xlu1 %v1764_v18, %s1665_s8  ;;  %978 = vrot.lane.b32.xlu0 %v1762_v17, %s1665_s8 }
  0x64   : > { %1055 = vrot.lane.b32.xlu1 %v1764_v18, %s1666_s9  ;;  %1053 = vrot.lane.b32.xlu0 %v1762_v17, %s1666_s9 }
  0x68   : > { %1130 = vrot.lane.b32.xlu1 %v1764_v18, %s1667_s10  ;;  %1128 = vrot.lane.b32.xlu0 %v1762_v17, %s1667_s10 }
  0x86   : > { %v288_v20 = vpop.permute.xlu1 %287  ;;  %v284_v21 = vpop.permute.xlu0 %283 }
  0x8a   : > { %v290_v22 = vpop.permute.xlu1 %289  ;;  %v286_v23 = vpop.permute.xlu0 %285 }
  0x8b   : > { %v300_v52 = vsel %vm297_vm0, %v288_v20, %v290_v22  ;;  %v298_v53 = vsel %vm297_vm0, %v284_v21, %v286_v23  ;;  %v299_v55 = vsel %vm297_vm0, %v286_v23, %v288_v20  ;;  %v1870_v23 = vadd.f32 %v266_v57, %v1834_v40 }
  0x8c   : > { %v312_v2 = vmul.f32 %v300_v52, %v1801_v30  ;;  %v310_v3 = vmul.f32 %v298_v53, %v1806_v31  ;;  %v311_v8 = vmul.f32 %v299_v55, %v1811_v32 }
  0x8e   : > { %v294_v24 = vpop.permute.xlu1 %293  ;;  %v292_v25 = vpop.permute.xlu0 %291  ;;  %v324_v21 = vrot.slane %v312_v2, 2 }
  0x8f   : > { %v301_v56 = vsel %vm297_vm0, %v290_v22, %v292_v25  ;;  %v302_v63 = vsel %vm297_vm0, %v292_v25, %v294_v24  ;;  %v322_v22 = vrot.slane %v310_v3, 2 }
  0x90   : > { %v313_v10 = vmul.f32 %v301_v56, %v1818_v35  ;;  %v314_v12 = vmul.f32 %v302_v63, %v1823_v36  ;;  %v336_v47 = vadd.f32 %v324_v21, %v275_v60 }
  0x91   : > { %v334_v48 = vadd.f32 %v322_v22, %v273_v62 }
  0x92   : > { %v341_v26 = vpop.permute.xlu1 %340  ;;  %v296_v27 = vpop.permute.xlu0 %295  ;;  %v325_v37 = vrot.slane %v313_v10, 2  ;;  %v326_v38 = vrot.slane %v314_v12, 2 }
  0x93   : > { %v303_v15 = vsel %vm297_vm0, %v294_v24, %v296_v27  ;;  %vm1268_vm0 = vcmask 113664  }
  0x94   : > { %v315_v39 = vmul.f32 %v303_v15, %v1834_v40  ;;  %v337_v54 = vadd.f32 %v325_v37, %v276_v9  ;;  %v338_v57 = vadd.f32 %v326_v38, %v277_v11 }
  0x96   : > { %v345_v28 = vpop.permute.xlu1 %344  ;;  %v343_v29 = vpop.permute.xlu0 %342  ;;  %v327_v58 = vrot.slane %v315_v39, 2 }
  0x97   : > { %v355_v4 = vsel %vm354_vm1, %v341_v26, %v343_v29  ;;  %v356_v5 = vsel %vm354_vm1, %v343_v29, %v345_v28 }
  0x98   : > { %v367_v16 = vmul.f32 %v355_v4, %v1806_v31  ;;  %v368_v19 = vmul.f32 %v356_v5, %v1811_v32  ;;  %v339_v39 = vadd.f32 %v327_v58, %v1870_v23 }
  0x9a   : > { %v1813_v33 = vpop.permute.xlu1 %348  ;;  %v347_v34 = vpop.permute.xlu0 %346  ;;  %v379_v41 = vrot.slane %v367_v16, 3  ;;  %v380_v44 = vrot.slane %v368_v19, 3 }
  0x9b   : > { %v357_v13 = vsel %vm354_vm1, %v345_v28, %v347_v34  ;;  %v358_v20 = vsel %vm354_vm1, %v347_v34, %v1813_v33  ;;  %v323_v28 = vrot.slane %v311_v8, 2 }
  0x9c   : > { %v369_v24 = vmul.f32 %v357_v13, %v1801_v30  ;;  %v370_v34 = vmul.f32 %v358_v20, %v1818_v35  ;;  %v391_v60 = vadd.f32 %v379_v41, %v334_v48 }
  0x9d   : > { %v335_v53 = vadd.f32 %v323_v28, %v274_v61 }
  0x9e   : > { %v1838_v42 = vpop.permute.xlu1 %352  ;;  %v1840_v43 = vpop.permute.xlu0 %350  ;;  %v381_v55 = vrot.slane %v369_v24, 3  ;;  %v382_v59 = vrot.slane %v370_v34, 3 }
  0x9f   : > { %v359_v1 = vsel %vm354_vm1, %v1813_v33, %v1840_v43  ;;  %v392_v62 = vadd.f32 %v380_v44, %v335_v53  ;;  %v360_v61 = vsel %vm354_vm1, %v1840_v43, %v1838_v42  ;;  %vm1343_vm1 = vcmask 277504  }
  0xa0   : > { %v393_v8 = vadd.f32 %v381_v55, %v336_v47  ;;  %v371_v9 = vmul.f32 %v359_v1, %v1823_v36  ;;  %v394_v11 = vadd.f32 %v382_v59, %v337_v54  ;;  %v372_v43 = vmul.f32 %v360_v61, %v1834_v40 }
  0xa2   : > { %v400_v50 = vpop.permute.xlu1 %399  ;;  %v398_v51 = vpop.permute.xlu0 %397  ;;  %v383_v28 = vrot.slane %v371_v9, 3  ;;  %v384_v34 = vrot.slane %v372_v43, 3 }
  0xa3   : > { %v412_v25 = vsel %vm411_vm2, %v398_v51, %v400_v50 }
  0xa4   : > { %v424_v45 = vmul.f32 %v412_v25, %v1806_v31  ;;  %v396_v58 = vadd.f32 %v384_v34, %v339_v39 }
  0xa6   : > { %v404_v6 = vpop.permute.xlu1 %403  ;;  %v402_v7 = vpop.permute.xlu0 %401  ;;  %v436_v63 = vrot.slane %v424_v45, 4 }
  0xa7   : > { %v413_v27 = vsel %vm411_vm2, %v400_v50, %v402_v7  ;;  %v414_v49 = vsel %vm411_vm2, %v402_v7, %v404_v6 }
  0xa8   : > { %v425_v51 = vmul.f32 %v413_v27, %v1811_v32  ;;  %v426_v2 = vmul.f32 %v414_v49, %v1801_v30  ;;  %v448_v14 = vadd.f32 %v436_v63, %v391_v60 }
  0xaa   : > { %v408_v26 = vpop.permute.xlu1 %407  ;;  %v406_v29 = vpop.permute.xlu0 %405  ;;  %v437_v3 = vrot.slane %v425_v51, 4  ;;  %v438_v15 = vrot.slane %v426_v2, 4 }
  0xab   : > { %v415_v56 = vsel %vm411_vm2, %v404_v6, %v406_v29  ;;  %v416_v4 = vsel %vm411_vm2, %v406_v29, %v408_v26 }
  0xac   : > { %v427_v5 = vmul.f32 %v415_v56, %v1818_v35  ;;  %v428_v16 = vmul.f32 %v416_v4, %v1823_v36  ;;  %v449_v19 = vadd.f32 %v437_v3, %v392_v62  ;;  %v450_v41 = vadd.f32 %v438_v15, %v393_v8 }
  0xae   : > { %v455_v50 = vpop.permute.xlu1 %454  ;;  %v410_v52 = vpop.permute.xlu0 %409  ;;  %v439_v20 = vrot.slane %v427_v5, 4  ;;  %v440_v44 = vrot.slane %v428_v16, 4 }
  0xaf   : > { %v417_v12 = vsel %vm411_vm2, %v408_v26, %v410_v52  ;;  %v395_v52 = vadd.f32 %v383_v28, %v338_v57  ;;  %vm1418_vm2 = vcmask 244736  }
  0xb0   : > { %v429_v37 = vmul.f32 %v417_v12, %v1834_v40  ;;  %v451_v45 = vadd.f32 %v439_v20, %v394_v11 }
  0xb1   : > { %v452_v57 = vadd.f32 %v440_v44, %v395_v52  ;;  %v604_v44 = vrot.slane %v1762_v17, 4 }
  0xb2   : > { %v459_v6 = vpop.permute.xlu1 %458  ;;  %v457_v7 = vpop.permute.xlu0 %456  ;;  %v441_v53 = vrot.slane %v429_v37, 4 }
  0xb3   : > { %v469_v33 = vsel %vm468_vm3, %v455_v50, %v457_v7  ;;  %v470_v10 = vsel %vm468_vm3, %v457_v7, %v459_v6 }
  0xb4   : > { %v481_v13 = vmul.f32 %v469_v33, %v1806_v31  ;;  %v482_v42 = vmul.f32 %v470_v10, %v1811_v32  ;;  %v453_v3 = vadd.f32 %v441_v53, %v396_v58 }
  0xb6   : > { %v493_v21 = vrot.slane %v481_v13, 5  ;;  %v494_v22 = vrot.slane %v482_v42, 5  ;;  %v463_v25 = vpop.permute.xlu1 %462  ;;  %v461_v29 = vpop.permute.xlu0 %460 }
  0xb7   : > { %v471_v26 = vsel %vm468_vm3, %v459_v6, %v461_v29  ;;  %v472_v31 = vsel %vm468_vm3, %v461_v29, %v463_v25 }
  0xb8   : > { %v505_v32 = vadd.f32 %v493_v21, %v448_v14  ;;  %v506_v24 = vadd.f32 %v494_v22, %v449_v19  ;;  %v483_v27 = vmul.f32 %v471_v26, %v1801_v30  ;;  %v484_v38 = vmul.f32 %v472_v31, %v1818_v35 }
  0xba   : > { %v514_v47 = vcombine.low %v505_v32, %v506_v24  ;;  %v495_v48 = vrot.slane %v483_v27, 5  ;;  %v496_v49 = vrot.slane %v484_v38, 5  ;;  %v467_v51 = vpop.permute.xlu1 %466  ;;  %v465_v50 = vpop.permute.xlu0 %464 }
  0xbb   : > { %v473_v54 = vsel %vm468_vm3, %v463_v25, %v465_v50  ;;  %v474_v55 = vsel %vm468_vm3, %v465_v50, %v467_v51  ;;  %vm1486_vm3 = vcmask 1040384  }
  0xbc   : > { %v521_v30 = vrot.slane %v514_v47, %v1879_v46  ;;  %v507_v35 = vadd.f32 %v495_v48, %v450_v41  ;;  %v508_v56 = vadd.f32 %v496_v49, %v451_v45  ;;  %v485_v23 = vmul.f32 %v473_v54, %v1823_v36 }
  0xbd   : > { %v486_v1 = vmul.f32 %v474_v55, %v1834_v40  ;;  %v605_v45 = vrot.slane %v1764_v18, 4 }
  0xbe   : > { %v528_v60 = vrot.slane %v521_v30, %v1879_v46  ;;  %v538_v62 = vcombine.low %v507_v35, %v508_v56  ;;  %v497_v63 = vrot.slane %v485_v23, 5  ;;  %v681_v2 = vpop.permute.xlu1 %680  ;;  %v679_v61 = vpop.permute.xlu0 %678 }
  0xbf   : > { %v498_v4 = vrot.slane %v486_v1, 5  ;;  %v683_v5 = vrot.slane %v681_v2, 4  ;;  %v682_v36 = vrot.slane %v679_v61, 4  ;;  %v1974_v49 = vsel %vm588_vm6, %v604_v44, %v605_v45 }
  0xc0   : > { %535 = vst.msk [vmem:[#allocation2 + $0x4] ss:$4 sm:$0x3] %vm1912_vm4, %v528_v60  ;;  %v545_v0 = vrot.slane %v538_v62, %v1879_v46  ;;  %v509_v6 = vadd.f32 %v497_v63, %v452_v57 }
  0xc1   : > { %v510_v40 = vadd.f32 %v498_v4, %v453_v3  ;;  %v684_v7 = vsel %vm588_vm6, %v682_v36, %v683_v5 }
  0xc2   : > { %v552_v8 = vrot.slane %v545_v0, %v1879_v46  ;;  %v1924_v9 = vsel %vm674_vm5, %v679_v61, %v684_v7  ;;  %v611_v33 = vpop.permute.xlu1 %610  ;;  %v609_v10 = vpop.permute.xlu0 %608 }
  0xc3   : > { %v558_v11 = vcombine.low %v509_v6, %v510_v40  ;;  %v613_v12 = vrot.slane %v611_v33, 4  ;;  %v612_v13 = vrot.slane %v609_v10, 4  ;;  %v687_v51 = vsub.f32 %v1974_v49, %v1924_v9 }
  0xc4   : > { %555 = vst.msk [vmem:[#allocation2 + $0x5] ss:$4 sm:$0x3] %vm1912_vm4, %v552_v8 }
  0xc5   : > { %v565_v42 = vrot.slane %v558_v11, %v1879_v46  ;;  %v614_v43 = vsel %vm588_vm6, %v612_v13, %v613_v12  ;;  %v712_v30 = vand.u32 2147483647, %v687_v51 }
  0xc6   : > { %v1931_v14 = vsel %vm598_vm7, %v609_v10, %v614_v43  ;;  %v756_v15 = vpop.permute.xlu1 %755  ;;  %v754_v16 = vpop.permute.xlu0 %753 }
  0xc7   : > { %v572_v19 = vrot.slane %v565_v42, %v1879_v46  ;;  %v758_v20 = vrot.slane %v756_v15, 4  ;;  %v757_v21 = vrot.slane %v754_v16, 4  ;;  %v617_v55 = vsub.f32 %v1974_v49, %v1931_v14 }
  0xc8   : > { %v714_v60 = vcombine.high %v712_v30, %v712_v30  ;;  %v716_v3 = vsel %vm622_vm11, %v712_v30, 0.0 }
  0xc9   : > { %575 = vst.msk [vmem:[#allocation2 + $0x6] ss:$4 sm:$0x3] %vm1912_vm4, %v572_v19  ;;  %v759_v22 = vsel %vm588_vm6, %v757_v21, %v758_v20  ;;  %v643_v56 = vand.u32 2147483647, %v617_v55  ;;  %v717_v8 = vrot.slane %v716_v3, 4 }
  0xca   : > { %v831_v25 = vpop.permute.xlu1 %830  ;;  %v829_v29 = vpop.permute.xlu0 %828  ;;  %v1938_v28 = vsel %vm749_vm8, %v754_v16, %v759_v22  ;;  %v723_v7 = vsel %vm622_vm11, %v714_v60, 0.0  ;;  %vm1500_vm4 = vcmask 0  }
  0xcb   : > { %v833_v37 = vrot.slane %v831_v25, 4  ;;  %v832_v26 = vrot.slane %v829_v29, 4  ;;  %v762_v57 = vsub.f32 %v1974_v49, %v1938_v28  ;;  %v645_v4 = vcombine.high %v643_v56, %v643_v56 }
  0xcc   : > { %v647_v10 = vsel %vm622_vm11, %v643_v56, 0.0  ;;  %v724_v42 = vrot.slane %v723_v7, 4  ;;  %v718_v22 = vadd.f32 %v717_v8, %v716_v3 }
  0xcd   : > { %v834_v31 = vsel %vm588_vm6, %v832_v26, %v833_v37  ;;  %v787_v0 = vand.u32 2147483647, %v762_v57  ;;  %v654_v11 = vsel %vm622_vm11, %v645_v4, 0.0  ;;  %v648_v19 = vrot.slane %v647_v10, 4 }
  0xce   : > { %v1944_v24 = vsel %vm824_vm9, %v829_v29, %v834_v31  ;;  %v906_v34 = vpop.permute.xlu1 %905  ;;  %v904_v41 = vpop.permute.xlu0 %903  ;;  %v655_v20 = vrot.slane %v654_v11, 4  ;;  %v725_v28 = vadd.f32 %v724_v42, %v723_v7 }
  0xcf   : > { %v908_v53 = vrot.slane %v906_v34, 4  ;;  %v907_v54 = vrot.slane %v904_v41, 4  ;;  %v837_v5 = vsub.f32 %v1974_v49, %v1944_v24  ;;  %v789_v43 = vcombine.high %v787_v0, %v787_v0 }
  0xd0   : > { %v577_v32 = vld [vmem:[#allocation2 + $0x8] sm:$0x7]  ;;  %v576_v46 = vld [vmem:[#allocation2] sm:$0x77]  ;;  %v791_v21 = vsel %vm622_vm11, %v787_v0, 0.0  ;;  %v649_v24 = vadd.f32 %v648_v19, %v647_v10 }
  0xd1   : > { %669 = vrot.lane.b32.xlu1 %v577_v32, %s1660_s29  ;;  %667 = vrot.lane.b32.xlu0 %v576_v46, %s1660_s29  ;;  %v587_v27 = vrot.slane %v577_v32, 4  ;;  %v586_v38 = vrot.slane %v576_v46, 4  ;;  %v862_v12 = vand.u32 2147483647, %v837_v5  ;;  %v798_v37 = vsel %vm622_vm11, %v789_v43, 0.0 }
  0xd2   : > { %v981_v47 = vpop.permute.xlu1 %980  ;;  %v979_v48 = vpop.permute.xlu0 %978  ;;  %v799_v34 = vrot.slane %v798_v37, 4  ;;  %v650_v30 = vrot.slane %v649_v24, 2 }
  0xd3   : > { %v1959_v39 = vsel %vm588_vm6, %v586_v38, %v587_v27  ;;  %v983_v35 = vrot.slane %v981_v47, 4  ;;  %v864_v25 = vcombine.high %v862_v12, %v862_v12  ;;  %v656_v27 = vadd.f32 %v655_v20, %v654_v11 }
  0xd4   : > { %v866_v38 = vsel %vm622_vm11, %v862_v12, 0.0  ;;  %v719_v47 = vrot.slane %v718_v22, 2  ;;  %v800_v56 = vadd.f32 %v799_v34, %v798_v37  ;;  %v651_v0 = vadd.f32 %v650_v30, %v649_v24 }
  0xd5   : > { %593 = vrot.lane.b32.xlu1 %v577_v32, %s1661_s30  ;;  %591 = vrot.lane.b32.xlu0 %v576_v46, %s1661_s30 }
  0xd6   : > { %v1056_v50 = vpop.permute.xlu1 %1055  ;;  %v1054_v52 = vpop.permute.xlu0 %1053  ;;  %v652_v19 = vrot.slane %v651_v0, 1 }
  0xd7   : > { %v1058_v23 = vrot.slane %v1056_v50, 4  ;;  %v1057_v58 = vrot.slane %v1054_v52, 4 }
  0xd9   : > { %744 = vrot.lane.b32.xlu1 %v577_v32, %s1662_s5  ;;  %742 = vrot.lane.b32.xlu0 %v576_v46, %s1662_s5  ;;  %v1059_v36 = vsel %vm588_vm6, %v1057_v58, %v1058_v23 }
  0xda   : > { %v1131_v59 = vpop.permute.xlu1 %1130  ;;  %v1129_v1 = vpop.permute.xlu0 %1128  ;;  %v1060_v9 = vsel %vm1049_vm13, %v1054_v52, %v1059_v36 }
  0xdb   : > { %v1133_v2 = vrot.slane %v1131_v59, 4  ;;  %v1132_v61 = vrot.slane %v1129_v1, 4  ;;  %v1062_v15 = vsub.f32 %v1974_v49, %v1060_v9 }
  0xdd   : > { %819 = vrot.lane.b32.xlu1 %v577_v32, %s1663_s6  ;;  %817 = vrot.lane.b32.xlu0 %v576_v46, %s1663_s6  ;;  %v1134_v33 = vsel %vm588_vm6, %v1132_v61, %v1133_v2 }
  0xde   : > { %v1135_v16 = vsel %vm1124_vm14, %v1129_v1, %v1134_v33  ;;  %v720_v1 = vadd.f32 %v719_v47, %v718_v22 }
  0xdf   : > { %v1137_v31 = vsub.f32 %v1974_v49, %v1135_v16 }
  0xe0   : > { %v721_v11 = vrot.slane %v720_v1, 1 }
  0xe1   : > { %894 = vrot.lane.b32.xlu1 %v577_v32, %s1664_s7  ;;  %892 = vrot.lane.b32.xlu0 %v576_v46, %s1664_s7  ;;  %v1162_v50 = vand.u32 2147483647, %v1137_v31 }
  0xe3   : > { %v1164_v60 = vcombine.high %v1162_v50, %v1162_v50  ;;  %v1166_v33 = vsel %vm622_vm11, %v1162_v50, 0.0 }
  0xe5   : > { %969 = vrot.lane.b32.xlu1 %v577_v32, %s1665_s8  ;;  %967 = vrot.lane.b32.xlu0 %v576_v46, %s1665_s8  ;;  %v1173_v10 = vsel %vm622_vm11, %v1164_v60, 0.0 }
  0xe6   : > { %v1174_v22 = vrot.slane %v1173_v10, 4 }
  0xe8   : > { %v1175_v47 = vadd.f32 %v1174_v22, %v1173_v10 }
  0xe9   : > { %1044 = vrot.lane.b32.xlu1 %v577_v32, %s1666_s9  ;;  %1042 = vrot.lane.b32.xlu0 %v576_v46, %s1666_s9 }
  0xed   : > { %1119 = vrot.lane.b32.xlu1 %v577_v32, %s1667_s10  ;;  %1117 = vrot.lane.b32.xlu0 %v576_v46, %s1667_s10 }
  0xf1   : > { %1194 = vrot.lane.b32.xlu1 %v577_v32, %s1669_s25  ;;  %1192 = vrot.lane.b32.xlu0 %v576_v46, %s1669_s25 }
  0xf5   : > { %1263 = vrot.lane.b32.xlu1 %v577_v32, %s1670_s26  ;;  %1261 = vrot.lane.b32.xlu0 %v576_v46, %s1670_s26 }
  0xf9   : > { %1338 = vrot.lane.b32.xlu1 %v577_v32, %s1671_s27  ;;  %1336 = vrot.lane.b32.xlu0 %v576_v46, %s1671_s27 }
  0xfd   : > { %1413 = vrot.lane.b32.xlu1 %v577_v32, %s1672_s28  ;;  %1411 = vrot.lane.b32.xlu0 %v576_v46, %s1672_s28  ;;  %v792_v32 = vrot.slane %v791_v21, 4  ;;  %v1087_v46 = vand.u32 2147483647, %v1062_v15 }
  0xff   : > { %v793_v52 = vadd.f32 %v792_v32, %v791_v21  ;;  %v1089_v55 = vcombine.high %v1087_v46, %v1087_v46  ;;  %v1091_v59 = vsel %vm622_vm11, %v1087_v46, 0.0  ;;  %v1167_v21 = vrot.slane %v1166_v33, 4 }
 0x100   : > { %v1092_v36 = vrot.slane %v1091_v59, 4 }
 0x101   : > { %1205 = vrot.lane.b32.xlu1 %v1764_v18, %s1669_s25  ;;  %1203 = vrot.lane.b32.xlu0 %v1762_v17, %s1669_s25  ;;  %v1098_v61 = vsel %vm622_vm11, %v1089_v55, 0.0 }
 0x102   : > { %v1099_v9 = vrot.slane %v1098_v61, 4  ;;  %v1093_v16 = vadd.f32 %v1092_v36, %v1091_v59 }
 0x104   : > { %v1100_v37 = vadd.f32 %v1099_v9, %v1098_v61  ;;  %v1094_v34 = vrot.slane %v1093_v16, 2 }
 0x105   : > { %1274 = vrot.lane.b32.xlu1 %v1764_v18, %s1670_s26  ;;  %1272 = vrot.lane.b32.xlu0 %v1762_v17, %s1670_s26 }
 0x109   : > { %1349 = vrot.lane.b32.xlu1 %v1764_v18, %s1671_s27  ;;  %1347 = vrot.lane.b32.xlu0 %v1762_v17, %s1671_s27 }
 0x10d   : > { %1424 = vrot.lane.b32.xlu1 %v1764_v18, %s1672_s28  ;;  %1422 = vrot.lane.b32.xlu0 %v1762_v17, %s1672_s28  ;;  %v982_v17 = vrot.slane %v979_v48, 4  ;;  %v909_v18 = vsel %vm588_vm6, %v907_v54, %v908_v53  ;;  %v867_v53 = vrot.slane %v866_v38, 4 }
 0x10e   : > { %v910_v62 = vsel %vm899_vm10, %v904_v41, %v909_v18  ;;  %v873_v41 = vsel %vm622_vm11, %v864_v25, 0.0 }
 0x10f   : > { %v984_v63 = vsel %vm588_vm6, %v982_v17, %v983_v35  ;;  %v912_v6 = vsub.f32 %v1974_v49, %v910_v62  ;;  %v657_v35 = vrot.slane %v656_v27, 2  ;;  %v874_v17 = vrot.slane %v873_v41, 4 }
 0x110   : > { %v985_v40 = vsel %vm974_vm12, %v979_v48, %v984_v63  ;;  %v726_v48 = vrot.slane %v725_v28, 2  ;;  %v794_v63 = vrot.slane %v793_v52, 2  ;;  %v868_v2 = vadd.f32 %v867_v53, %v866_v38 }
 0x111   : > { %v987_v13 = vsub.f32 %v1974_v49, %v985_v40  ;;  %v937_v14 = vand.u32 2147483647, %v912_v6  ;;  %v875_v3 = vadd.f32 %v874_v17, %v873_v41  ;;  %v658_v6 = vadd.f32 %v657_v35, %v656_v27 }
 0x112   : > { %v727_v62 = vadd.f32 %v726_v48, %v725_v28  ;;  %v801_v40 = vrot.slane %v800_v56, 2  ;;  %v869_v42 = vrot.slane %v868_v2, 2  ;;  %v2016_v41 = vadd.f32 %v652_v19, %v651_v0 }
 0x113   : > { %v1012_v29 = vand.u32 2147483647, %v987_v13  ;;  %v939_v26 = vcombine.high %v937_v14, %v937_v14  ;;  %v941_v44 = vsel %vm622_vm11, %v937_v14, 0.0  ;;  %v795_v13 = vadd.f32 %v794_v63, %v793_v52 }
 0x114   : > { %v942_v18 = vrot.slane %v941_v44, 4  ;;  %v728_v12 = vrot.slane %v727_v62, 1  ;;  %v876_v43 = vrot.slane %v875_v3, 2  ;;  %v802_v20 = vadd.f32 %v801_v40, %v800_v56 }
 0x115   : > { %v1014_v45 = vcombine.high %v1012_v29, %v1012_v29  ;;  %v948_v51 = vsel %vm622_vm11, %v939_v26, 0.0  ;;  %v1016_v54 = vsel %vm622_vm11, %v1012_v29, 0.0  ;;  %v659_v25 = vrot.slane %v658_v6, 1 }
 0x116   : > { %v949_v23 = vrot.slane %v948_v51, 4  ;;  %v1017_v57 = vrot.slane %v1016_v54, 4  ;;  %v943_v4 = vadd.f32 %v942_v18, %v941_v44  ;;  %v2012_v26 = vadd.f32 %v721_v11, %v720_v1 }
 0x117   : > { %v1023_v58 = vsel %vm622_vm11, %v1014_v45, 0.0  ;;  %v2014_v31 = vadd.f32 %v728_v12, %v727_v62  ;;  %v796_v32 = vrot.slane %v795_v13, 1  ;;  %v870_v46 = vadd.f32 %v869_v42, %v868_v2 }
 0x118   : > { %v1024_v5 = vrot.slane %v1023_v58, 4  ;;  %v950_v7 = vadd.f32 %v949_v23, %v948_v51  ;;  %v1018_v8 = vadd.f32 %v1017_v57, %v1016_v54  ;;  %v944_v14 = vrot.slane %v943_v4, 2 }
 0x119   : > { %v877_v24 = vadd.f32 %v876_v43, %v875_v3  ;;  %v803_v44 = vrot.slane %v802_v20, 1  ;;  %v1168_v45 = vadd.f32 %v1167_v21, %v1166_v33  ;;  %v2018_v48 = vadd.f32 %v659_v25, %v658_v6 }
 0x11a   : > { %v1025_v15 = vadd.f32 %v1024_v5, %v1023_v58  ;;  %v951_v29 = vrot.slane %v950_v7, 2  ;;  %v1019_v28 = vrot.slane %v1018_v8, 2  ;;  %v945_v27 = vadd.f32 %v944_v14, %v943_v4 }
 0x11b   : > { %v1101_v52 = vrot.slane %v1100_v37, 2  ;;  %v2020_v55 = vadd.f32 %v796_v32, %v795_v13  ;;  %v871_v30 = vrot.slane %v870_v46, 1  ;;  %v878_v18 = vrot.slane %v877_v24, 1 }
 0x11c   : > { %v1026_v38 = vrot.slane %v1025_v15, 2  ;;  %v952_v51 = vadd.f32 %v951_v29, %v950_v7  ;;  %v1020_v50 = vadd.f32 %v1019_v28, %v1018_v8  ;;  %v946_v56 = vrot.slane %v945_v27, 1 }
 0x11d   : > { %v1095_v58 = vadd.f32 %v1094_v34, %v1093_v16  ;;  %v2022_v59 = vadd.f32 %v803_v44, %v802_v20  ;;  %v1169_v1 = vrot.slane %v1168_v45, 2  ;;  %v1176_v57 = vrot.slane %v1175_v47, 2 }
 0x11e   : > { %v1027_v23 = vadd.f32 %v1026_v38, %v1025_v15  ;;  %v953_v62 = vrot.slane %v952_v51, 1  ;;  %v1021_v63 = vrot.slane %v1020_v50, 1  ;;  %v1102_v2 = vadd.f32 %v1101_v52, %v1100_v37 }
 0x11f   : > { %v2026_v5 = vadd.f32 %v871_v30, %v870_v46  ;;  %v2029_v40 = vadd.f32 %v878_v18, %v877_v24  ;;  %v2031_v7 = vadd.f32 %v946_v56, %v945_v27  ;;  %v1096_v9 = vrot.slane %v1095_v58, 1 }
 0x120   : > { %v1028_v8 = vrot.slane %v1027_v23, 1  ;;  %v1170_v33 = vadd.f32 %v1169_v1, %v1168_v45  ;;  %v1177_v10 = vadd.f32 %v1176_v57, %v1175_v47  ;;  %v2034_v13 = vadd.f32 %v953_v62, %v952_v51 }
 0x121   : > { %v2036_v42 = vadd.f32 %v1021_v63, %v1020_v50  ;;  %v1103_v43 = vrot.slane %v1102_v2, 1  ;;  %v2043_v29 = vadd.f32 %v1096_v9, %v1095_v58 }
 0x122   : > { %v2041_v25 = vadd.f32 %v1028_v8, %v1027_v23  ;;  %v1171_v32 = vrot.slane %v1170_v33, 1  ;;  %v1178_v46 = vrot.slane %v1177_v10, 1 }
 0x123   : > { %v2046_v38 = vadd.f32 %v1103_v43, %v1102_v2 }
 0x124   : > { %v2052_v56 = vadd.f32 %v1171_v32, %v1170_v33  ;;  %v2054_v23 = vadd.f32 %v1178_v46, %v1177_v10 }
 0x143   : > { %v670_v53 = vpop.permute.xlu1 %669  ;;  %v668_v54 = vpop.permute.xlu0 %667 }
 0x144   : > { %v672_v35 = vrot.slane %v670_v53, 4  ;;  %v671_v17 = vrot.slane %v668_v54, 4 }
 0x146   : > { %v673_v60 = vsel %vm588_vm6, %v671_v17, %v672_v35 }
 0x147   : > { %v675_v61 = vsel %vm674_vm5, %v668_v54, %v673_v60  ;;  %v594_v3 = vpop.permute.xlu1 %593  ;;  %v592_v4 = vpop.permute.xlu0 %591 }
 0x148   : > { %v677_v36 = vsub.f32 %v1959_v39, %v675_v61  ;;  %v596_v0 = vrot.slane %v594_v3, 4  ;;  %v595_v6 = vrot.slane %v592_v4, 4 }
 0x14a   : > { %v688_v11 = vmul.f32 %v677_v36, %v677_v36  ;;  %v597_v12 = vsel %vm588_vm6, %v595_v6, %v596_v0 }
 0x14b   : > { %v599_v14 = vsel %vm598_vm7, %v592_v4, %v597_v12  ;;  %v745_v15 = vpop.permute.xlu1 %744  ;;  %v743_v16 = vpop.permute.xlu0 %742 }
 0x14c   : > { %v690_v19 = vcombine.high %v688_v11, %v688_v11  ;;  %v692_v20 = vsel %vm622_vm11, %v688_v11, 0.0  ;;  %v601_v21 = vsub.f32 %v1959_v39, %v599_v14  ;;  %v747_v22 = vrot.slane %v745_v15, 4 }
 0x14d   : > { %v693_v28 = vrot.slane %v692_v20, 4  ;;  %v746_v37 = vrot.slane %v743_v16, 4 }
 0x14e   : > { %v699_v24 = vsel %vm622_vm11, %v690_v19, 0.0  ;;  %v618_v27 = vmul.f32 %v601_v21, %v601_v21 }
 0x14f   : > { %v694_v34 = vadd.f32 %v693_v28, %v692_v20  ;;  %v700_v44 = vrot.slane %v699_v24, 4  ;;  %v748_v45 = vsel %vm588_vm6, %v746_v37, %v747_v22  ;;  %v820_v47 = vpop.permute.xlu1 %819  ;;  %v818_v51 = vpop.permute.xlu0 %817 }
 0x150   : > { %v620_v50 = vcombine.high %v618_v27, %v618_v27  ;;  %v623_v52 = vsel %vm622_vm11, %v618_v27, 0.0  ;;  %v750_v53 = vsel %vm749_vm8, %v743_v16, %v748_v45  ;;  %v822_v54 = vrot.slane %v820_v47, 4 }
 0x151   : > { %v695_v30 = vrot.slane %v694_v34, 2  ;;  %v701_v35 = vadd.f32 %v700_v44, %v699_v24  ;;  %v624_v17 = vrot.slane %v623_v52, 4  ;;  %v752_v18 = vsub.f32 %v1959_v39, %v750_v53 }
 0x152   : > { %v630_v58 = vsel %vm622_vm11, %v620_v50, 0.0  ;;  %v821_v1 = vrot.slane %v818_v51, 4 }
 0x153   : > { %v696_v57 = vadd.f32 %v695_v30, %v694_v34  ;;  %v702_v60 = vrot.slane %v701_v35, 2  ;;  %v625_v62 = vadd.f32 %v624_v17, %v623_v52  ;;  %v631_v63 = vrot.slane %v630_v58, 4  ;;  %v895_v2 = vpop.permute.xlu1 %894  ;;  %v893_v61 = vpop.permute.xlu0 %892 }
 0x154   : > { %v763_v3 = vmul.f32 %v752_v18, %v752_v18  ;;  %v823_v4 = vsel %vm588_vm6, %v821_v1, %v822_v54  ;;  %v897_v36 = vrot.slane %v895_v2, 4  ;;  %v896_v0 = vrot.slane %v893_v61, 4 }
 0x155   : > { %v697_v6 = vrot.slane %v696_v57, 1  ;;  %v703_v8 = vadd.f32 %v702_v60, %v701_v35  ;;  %v626_v9 = vrot.slane %v625_v62, 2  ;;  %v632_v33 = vadd.f32 %v631_v63, %v630_v58 }
 0x156   : > { %v765_v10 = vcombine.high %v763_v3, %v763_v3  ;;  %v767_v11 = vsel %vm622_vm11, %v763_v3, 0.0  ;;  %v825_v12 = vsel %vm824_vm9, %v818_v51, %v823_v4  ;;  %v898_v43 = vsel %vm588_vm6, %v896_v0, %v897_v36 }
 0x157   : > { %v698_v14 = vadd.f32 %v697_v6, %v696_v57  ;;  %v704_v15 = vrot.slane %v703_v8, 1  ;;  %v627_v16 = vadd.f32 %v626_v9, %v625_v62  ;;  %v633_v19 = vrot.slane %v632_v33, 2  ;;  %v970_v17 = vpop.permute.xlu1 %969  ;;  %v968_v18 = vpop.permute.xlu0 %967 }
 0x158   : > { %v768_v20 = vrot.slane %v767_v11, 4  ;;  %v774_v21 = vsel %vm622_vm11, %v765_v10, 0.0  ;;  %v827_v22 = vsub.f32 %v1959_v39, %v825_v12  ;;  %v900_v28 = vsel %vm899_vm10, %v893_v61, %v898_v43 }
 0x159   : > { %v705_v37 = vadd.f32 %v704_v15, %v703_v8  ;;  %v706_v32 = vmul.f32 -0.005, %v698_v14  ;;  %v628_v46 = vrot.slane %v627_v16, 1  ;;  %v634_v24 = vadd.f32 %v633_v19, %v632_v33 }
 0x15a   : > { %v769_v27 = vadd.f32 %v768_v20, %v767_v11  ;;  %v775_v34 = vrot.slane %v774_v21, 4  ;;  %v838_v44 = vmul.f32 %v827_v22, %v827_v22  ;;  %v902_v45 = vsub.f32 %v1959_v39, %v900_v28 }
 0x15b   : > { %v707_v47 = vmul.f32 -0.005, %v705_v37  ;;  %v708_v51 = vmul.f32 1.442695, %v706_v32  ;;  %v629_v50 = vadd.f32 %v628_v46, %v627_v16  ;;  %v635_v52 = vrot.slane %v634_v24, 1  ;;  %v2067_v15 = vpop.permute.xlu1 %1044  ;;  %v2069_v16 = vpop.permute.xlu0 %1042 }
 0x15c   : > { %v770_v53 = vrot.slane %v769_v27, 2  ;;  %v776_v54 = vadd.f32 %v775_v34, %v774_v21  ;;  %v840_v30 = vcombine.high %v838_v44, %v838_v44  ;;  %v842_v35 = vsel %vm622_vm11, %v838_v44, 0.0 }
 0x15d   : > { %1599 = vpow2.f32 %v708_v51  ;;  %v710_v58 = vmul.f32 1.442695, %v707_v47  ;;  %v636_v1 = vadd.f32 %v635_v52, %v634_v24  ;;  %v637_v57 = vmul.f32 -0.005, %v629_v50  ;;  %v2078_v52 = vld [vmem:[%s2267_s3] sm:$0xff] }
 0x15e   : > { %v771_v60 = vadd.f32 %v770_v53, %v769_v27  ;;  %v777_v62 = vrot.slane %v776_v54, 2  ;;  %v843_v63 = vrot.slane %v842_v35, 4  ;;  %v849_v2 = vsel %vm622_vm11, %v840_v30, 0.0 }
 0x15f   : > { %1601 = vpow2.f32 %v710_v58  ;;  %v638_v61 = vmul.f32 -0.005, %v636_v1  ;;  %v639_v3 = vmul.f32 1.442695, %v637_v57  ;;  %v850_v4 = vrot.slane %v849_v2, 4  ;;  %v1120_v57 = vpop.permute.xlu1 %1119 }
 0x160   : > { %v772_v36 = vrot.slane %v771_v60, 1  ;;  %v778_v0 = vadd.f32 %v777_v62, %v776_v54  ;;  %v844_v6 = vadd.f32 %v843_v63, %v842_v35  ;;  %v913_v8 = vmul.f32 %v902_v45, %v902_v45  ;;  %v2086_v63 = vld [vmem:[%s2267_s3 + $0x8] sm:$0xff] }
 0x161   : > { %1603 = vpow2.f32 %v639_v3  ;;  %v641_v9 = vmul.f32 1.442695, %v638_v61  ;;  %v851_v33 = vadd.f32 %v850_v4, %v849_v2  ;;  %v972_v10 = vrot.slane %v970_v17, 4 }
 0x162   : > { %v773_v11 = vadd.f32 %v772_v36, %v771_v60  ;;  %v779_v12 = vrot.slane %v778_v0, 1  ;;  %v845_v43 = vrot.slane %v844_v6, 2  ;;  %v915_v14 = vcombine.high %v913_v8, %v913_v8  ;;  %v1118_v60 = vpop.permute.xlu0 %1117 }
 0x163   : > { %1605 = vpow2.f32 %v641_v9  ;;  %v852_v19 = vrot.slane %v851_v33, 2  ;;  %v917_v20 = vsel %vm622_vm11, %v913_v8, 0.0  ;;  %v971_v21 = vrot.slane %v968_v18, 4 }
 0x164   : > { %v780_v22 = vadd.f32 %v779_v12, %v778_v0  ;;  %v781_v28 = vmul.f32 -0.005, %v773_v11  ;;  %v846_v37 = vadd.f32 %v845_v43, %v844_v6  ;;  %v918_v32 = vrot.slane %v917_v20, 4 }
 0x165   : > { %v853_v46 = vadd.f32 %v852_v19, %v851_v33  ;;  %v924_v24 = vsel %vm622_vm11, %v915_v14, 0.0  ;;  %v973_v27 = vsel %vm588_vm6, %v971_v21, %v972_v10  ;;  %v1047_v34 = vrot.slane %v2067_v15, 4 }
 0x166   : > { %v782_v44 = vmul.f32 -0.005, %v780_v22  ;;  %v783_v45 = vmul.f32 1.442695, %v781_v28  ;;  %v847_v47 = vrot.slane %v846_v37, 1  ;;  %v919_v51 = vadd.f32 %v918_v32, %v917_v20  ;;  %v1193_v32 = vpop.permute.xlu0 %1192 }
 0x167   : > { %v1600_v50 = vpop.eup %1599  ;;  %v854_v53 = vrot.slane %v853_v46, 1  ;;  %v925_v54 = vrot.slane %v924_v24, 4  ;;  %v975_v30 = vsel %vm974_vm12, %v968_v18, %v973_v27  ;;  %v1046_v35 = vrot.slane %v2069_v16, 4 }
 0x168   : > { %v730_v17 = vmul.f32 %v1600_v50, %v2012_v26  ;;  %1607 = vpow2.f32 %v783_v45  ;;  %v785_v58 = vmul.f32 1.442695, %v782_v44  ;;  %v848_v1 = vadd.f32 %v847_v47, %v846_v37  ;;  %v1195_v37 = vpop.permute.xlu1 %1194 }
 0x169   : > { %v1602_v62 = vpop.eup %1601  ;;  %v855_v2 = vadd.f32 %v854_v53, %v853_v46  ;;  %v920_v61 = vrot.slane %v919_v51, 2  ;;  %v926_v3 = vadd.f32 %v925_v54, %v924_v24  ;;  %v977_v18 = vsub.f32 %v1959_v39, %v975_v30 }
 0x16a   : > { %v731_v4 = vmul.f32 %v1602_v62, %v2014_v31  ;;  %v2091_v26 = vmul.f32 %v730_v17, %v2078_v52  ;;  %1609 = vpow2.f32 %v785_v58  ;;  %v856_v36 = vmul.f32 -0.005, %v848_v1 }
 0x16b   : > { %v1604_v0 = vpop.eup %1603  ;;  %v857_v6 = vmul.f32 -0.005, %v855_v2  ;;  %v921_v8 = vadd.f32 %v920_v61, %v919_v51  ;;  %v927_v9 = vrot.slane %v926_v3, 2  ;;  %v988_v33 = vmul.f32 %v977_v18, %v977_v18 }
 0x16c   : > { %v2094_v10 = vmul.f32 %v731_v4, %v2086_v63  ;;  %v736_v11 = vrot.slane %v2091_v26, 1  ;;  %v661_v12 = vmul.f32 %v1604_v0, %v2016_v41  ;;  %v858_v43 = vmul.f32 1.442695, %v856_v36  ;;  %v1264_v36 = vpop.permute.xlu1 %1263  ;;  %v2114_v0 = vpop.permute.xlu0 %1261 }
 0x16d   : > { %v1606_v31 = vpop.eup %1605  ;;  %v860_v14 = vmul.f32 1.442695, %v857_v6  ;;  %v922_v15 = vrot.slane %v921_v8, 1  ;;  %v928_v19 = vadd.f32 %v927_v9, %v926_v3  ;;  %v990_v20 = vcombine.high %v988_v33, %v988_v33 }
 0x16e   : > { %v2099_v21 = vmul.f32 %v1606_v31, %v2018_v48  ;;  %v2102_v22 = vmul.f32 %v661_v12, %v2078_v52  ;;  %1611 = vpow2.f32 %v858_v43  ;;  %v992_v28 = vsel %vm622_vm11, %v988_v33, 0.0 }
 0x16f   : > { %1613 = vpow2.f32 %v860_v14  ;;  %v923_v41 = vadd.f32 %v922_v15, %v921_v8  ;;  %v929_v46 = vrot.slane %v928_v19, 1  ;;  %v993_v24 = vrot.slane %v992_v28, 4 }
 0x170   : > { %v999_v27 = vsel %vm622_vm11, %v990_v20, 0.0  ;;  %v1048_v44 = vsel %vm588_vm6, %v1046_v35, %v1047_v34  ;;  %v1122_v45 = vrot.slane %v1120_v57, 4  ;;  %v1121_v47 = vrot.slane %v1118_v60, 4 }
 0x171   : > { %v930_v48 = vadd.f32 %v929_v46, %v928_v19  ;;  %v931_v51 = vmul.f32 -0.005, %v923_v41  ;;  %v994_v50 = vadd.f32 %v993_v24, %v992_v28  ;;  %v1000_v53 = vrot.slane %v999_v27, 4 }
 0x172   : > { %v1608_v54 = vpop.eup %1607  ;;  %v1050_v30 = vsel %vm1049_vm13, %v2069_v16, %v1048_v44  ;;  %v1123_v17 = vsel %vm588_vm6, %v1121_v47, %v1122_v45  ;;  %v1197_v58 = vrot.slane %v1195_v37, 4  ;;  %v1196_v1 = vrot.slane %v1193_v32, 4 }
 0x173   : > { %v805_v62 = vmul.f32 %v1608_v54, %v2020_v55  ;;  %v932_v2 = vmul.f32 -0.005, %v930_v48  ;;  %v933_v61 = vmul.f32 1.442695, %v931_v51  ;;  %v995_v3 = vrot.slane %v994_v50, 2 }
 0x174   : > { %v1610_v34 = vpop.eup %1609  ;;  %v1001_v35 = vadd.f32 %v1000_v53, %v999_v27  ;;  %v1052_v57 = vsub.f32 %v1959_v39, %v1050_v30  ;;  %v1125_v18 = vsel %vm1124_vm14, %v1118_v60, %v1123_v17  ;;  %v1198_v4 = vsel %vm588_vm6, %v1196_v1, %v1197_v58 }
 0x175   : > { %v2117_v16 = vmul.f32 %v1610_v34, %v2022_v59  ;;  %v2120_v6 = vmul.f32 %v805_v62, %v2078_v52  ;;  %1615 = vpow2.f32 %v933_v61  ;;  %v935_v55 = vmul.f32 1.442695, %v932_v2 }
 0x176   : > { %v996_v8 = vadd.f32 %v995_v3, %v994_v50  ;;  %v1002_v9 = vrot.slane %v1001_v35, 2  ;;  %v1063_v33 = vmul.f32 %v1052_v57, %v1052_v57  ;;  %v1127_v12 = vsub.f32 %v1959_v39, %v1125_v18 }
 0x177   : > { %1617 = vpow2.f32 %v935_v55  ;;  %v1200_v60 = vsel %vm1199_vm15, %v1193_v32, %v1198_v4  ;;  %v1266_v43 = vrot.slane %v1264_v36, 4  ;;  %v1265_v31 = vrot.slane %v2114_v0, 4 }
 0x178   : > { %v1612_v14 = vpop.eup %1611  ;;  %v997_v59 = vrot.slane %v996_v8, 1  ;;  %v1003_v15 = vadd.f32 %v1002_v9, %v1001_v35  ;;  %v1065_v19 = vcombine.high %v1063_v33, %v1063_v33  ;;  %v1067_v20 = vsel %vm622_vm11, %v1063_v33, 0.0 }
 0x179   : > { %v1614_v28 = vpop.eup %1613  ;;  %v2127_v37 = vmul.f32 %v1612_v14, %v2026_v5  ;;  %v1068_v41 = vrot.slane %v1067_v20, 4  ;;  %v1138_v46 = vmul.f32 %v1127_v12, %v1127_v12  ;;  %v1202_v24 = vsub.f32 %v1959_v39, %v1200_v60 }
 0x17a   : > { %v2131_v32 = vmul.f32 %v1614_v28, %v2029_v40  ;;  %v998_v27 = vadd.f32 %v997_v59, %v996_v8  ;;  %v1004_v44 = vrot.slane %v1003_v15, 1  ;;  %v1074_v45 = vsel %vm622_vm11, %v1065_v19, 0.0 }
 0x17b   : > { %v1069_v47 = vadd.f32 %v1068_v41, %v1067_v20  ;;  %v1075_v48 = vrot.slane %v1074_v45, 4  ;;  %v1140_v51 = vcombine.high %v1138_v46, %v1138_v46  ;;  %v1142_v50 = vsel %vm622_vm11, %v1138_v46, 0.0 }
 0x17c   : > { %v1005_v53 = vadd.f32 %v1004_v44, %v1003_v15  ;;  %v1006_v54 = vmul.f32 -0.005, %v998_v27  ;;  %v1143_v5 = vrot.slane %v1142_v50, 4  ;;  %v1213_v30 = vmul.f32 %v1202_v24, %v1202_v24 }
 0x17d   : > { %v1070_v17 = vrot.slane %v1069_v47, 2  ;;  %v1076_v58 = vadd.f32 %v1075_v48, %v1074_v45  ;;  %v1149_v1 = vsel %vm622_vm11, %v1140_v51, 0.0  ;;  %v1267_v40 = vsel %vm588_vm6, %v1265_v31, %v1266_v43  ;;  %v1339_v31 = vpop.permute.xlu1 %1338 }
 0x17e   : > { %v1007_v62 = vmul.f32 -0.005, %v1005_v53  ;;  %v1008_v2 = vmul.f32 1.442695, %v1006_v54  ;;  %v1144_v61 = vadd.f32 %v1143_v5, %v1142_v50  ;;  %v1150_v3 = vrot.slane %v1149_v1, 4 }
 0x17f   : > { %v1616_v34 = vpop.eup %1615  ;;  %v1071_v35 = vadd.f32 %v1070_v17, %v1069_v47  ;;  %v1077_v57 = vrot.slane %v1076_v58, 2  ;;  %v1215_v18 = vcombine.high %v1213_v30, %v1213_v30  ;;  %v1217_v4 = vsel %vm622_vm11, %v1213_v30, 0.0 }
 0x180   : > { %v2139_v36 = vmul.f32 %v1616_v34, %v2031_v7  ;;  %1619 = vpow2.f32 %v1008_v2  ;;  %v1010_v55 = vmul.f32 1.442695, %v1007_v62  ;;  %v1145_v8 = vrot.slane %v1144_v61, 2  ;;  %v1337_v7 = vpop.permute.xlu0 %1336 }
 0x181   : > { %v2141_v9 = vpop.eup %1617  ;;  %v1072_v33 = vrot.slane %v1071_v35, 1  ;;  %v1078_v12 = vadd.f32 %v1077_v57, %v1076_v58  ;;  %v1151_v60 = vadd.f32 %v1150_v3, %v1149_v1  ;;  %v1218_v43 = vrot.slane %v1217_v4, 4  ;;  %v1414_v1 = vpop.permute.xlu1 %1413 }
 0x182   : > { %1621 = vpow2.f32 %v1010_v55  ;;  %v1146_v14 = vadd.f32 %v1145_v8, %v1144_v61  ;;  %v1224_v59 = vsel %vm622_vm11, %v1215_v18, 0.0  ;;  %v1269_v15 = vsel %vm1268_vm0, %v2114_v0, %v1267_v40 }
 0x183   : > { %v1073_v19 = vadd.f32 %v1072_v33, %v1071_v35  ;;  %v1079_v20 = vrot.slane %v1078_v12, 1  ;;  %v1152_v28 = vrot.slane %v1151_v60, 2  ;;  %v1219_v41 = vadd.f32 %v1218_v43, %v1217_v4 }
 0x184   : > { %v1147_v46 = vrot.slane %v1146_v14, 1  ;;  %v1225_v24 = vrot.slane %v1224_v59, 4  ;;  %v1271_v27 = vsub.f32 %v1959_v39, %v1269_v15  ;;  %v1341_v44 = vrot.slane %v1339_v31, 4  ;;  %v1412_v3 = vpop.permute.xlu0 %1411 }
 0x185   : > { %v1080_v45 = vadd.f32 %v1079_v20, %v1078_v12  ;;  %v1081_v47 = vmul.f32 -0.005, %v1073_v19  ;;  %v1153_v48 = vadd.f32 %v1152_v28, %v1151_v60  ;;  %v1220_v51 = vrot.slane %v1219_v41, 2 }
 0x186   : > { %v1148_v50 = vadd.f32 %v1147_v46, %v1146_v14  ;;  %v1226_v53 = vadd.f32 %v1225_v24, %v1224_v59  ;;  %v1282_v54 = vmul.f32 %v1271_v27, %v1271_v27  ;;  %v1340_v5 = vrot.slane %v1337_v7, 4  ;;  %v1206_v46 = vpop.permute.xlu1 %1205 }
 0x187   : > { %v1082_v0 = vmul.f32 -0.005, %v1080_v45  ;;  %v1083_v30 = vmul.f32 1.442695, %v1081_v47  ;;  %v1154_v17 = vrot.slane %v1153_v48, 1  ;;  %v1221_v58 = vadd.f32 %v1220_v51, %v1219_v41 }
 0x188   : > { %v1156_v40 = vmul.f32 -0.005, %v1148_v50  ;;  %v1227_v62 = vrot.slane %v1226_v53, 2  ;;  %v1284_v2 = vcombine.high %v1282_v54, %v1282_v54  ;;  %v1286_v61 = vsel %vm622_vm11, %v1282_v54, 0.0 }
 0x189   : > { %1623 = vpow2.f32 %v1083_v30  ;;  %v1085_v34 = vmul.f32 1.442695, %v1082_v0  ;;  %v1155_v35 = vadd.f32 %v1154_v17, %v1153_v48  ;;  %v1222_v57 = vrot.slane %v1221_v58, 1  ;;  %v1204_v48 = vpop.permute.xlu0 %1203 }
 0x18a   : > { %v2148_v18 = vpop.eup %1619  ;;  %v1158_v4 = vmul.f32 1.442695, %v1156_v40  ;;  %v1228_v55 = vadd.f32 %v1227_v62, %v1226_v53  ;;  %v1287_v8 = vrot.slane %v1286_v61, 4  ;;  %v1293_v33 = vsel %vm622_vm11, %v1284_v2, 0.0 }
 0x18b   : > { %1625 = vpow2.f32 %v1085_v34  ;;  %v1157_v12 = vmul.f32 -0.005, %v1155_v35  ;;  %v1223_v60 = vadd.f32 %v1222_v57, %v1221_v58  ;;  %v1294_v43 = vrot.slane %v1293_v33, 4 }
 0x18c   : > { %v2151_v31 = vpop.eup %1621  ;;  %1627 = vpow2.f32 %v1158_v4  ;;  %v1229_v14 = vrot.slane %v1228_v55, 1  ;;  %v1288_v59 = vadd.f32 %v1287_v8, %v1286_v61  ;;  %v1342_v15 = vsel %vm588_vm6, %v1340_v5, %v1341_v44  ;;  %v1275_v4 = vpop.permute.xlu1 %1274 }
 0x18d   : > { %v1160_v19 = vmul.f32 1.442695, %v1157_v12  ;;  %v1231_v20 = vmul.f32 -0.005, %v1223_v60  ;;  %v1295_v28 = vadd.f32 %v1294_v43, %v1293_v33  ;;  %v1344_v41 = vsel %vm1343_vm1, %v1337_v7, %v1342_v15  ;;  %v1273_v12 = vpop.permute.xlu0 %1272 }
 0x18e   : > { %v1230_v24 = vadd.f32 %v1229_v14, %v1228_v55  ;;  %v1289_v27 = vrot.slane %v1288_v59, 2  ;;  %v1346_v45 = vsub.f32 %v1959_v39, %v1344_v41  ;;  %v1416_v47 = vrot.slane %v1414_v1, 4 }
 0x18f   : > { %1629 = vpow2.f32 %v1160_v19  ;;  %v1233_v51 = vmul.f32 1.442695, %v1231_v20  ;;  %v1296_v50 = vrot.slane %v1295_v28, 2  ;;  %v1415_v53 = vrot.slane %v1412_v3, 4 }
 0x190   : > { %v1232_v54 = vmul.f32 -0.005, %v1230_v24  ;;  %v1290_v0 = vadd.f32 %v1289_v27, %v1288_v59  ;;  %v1357_v30 = vmul.f32 %v1346_v45, %v1346_v45  ;;  %v1208_v44 = vrot.slane %v1206_v46, 4 }
 0x191   : > { %1631 = vpow2.f32 %v1233_v51  ;;  %v1297_v5 = vadd.f32 %v1296_v50, %v1295_v28  ;;  %v1417_v17 = vsel %vm588_vm6, %v1415_v53, %v1416_v47  ;;  %v1207_v7 = vrot.slane %v1204_v48, 4 }
 0x192   : > { %v1235_v58 = vmul.f32 1.442695, %v1232_v54  ;;  %v1291_v40 = vrot.slane %v1290_v0, 1  ;;  %v1359_v62 = vcombine.high %v1357_v30, %v1357_v30  ;;  %v1361_v2 = vsel %vm622_vm11, %v1357_v30, 0.0 }
 0x193   : > { %v2158_v1 = vpop.eup %1623  ;;  %v1298_v61 = vrot.slane %v1297_v5, 1  ;;  %v1362_v34 = vrot.slane %v1361_v2, 4  ;;  %v1419_v35 = vsel %vm1418_vm2, %v1412_v3, %v1417_v17  ;;  %v1209_v57 = vsel %vm588_vm6, %v1207_v7, %v1208_v44 }
 0x194   : > { %1633 = vpow2.f32 %v1235_v58  ;;  %v1292_v55 = vadd.f32 %v1291_v40, %v1290_v0  ;;  %v1368_v8 = vsel %vm622_vm11, %v1359_v62, 0.0  ;;  %v1421_v33 = vsub.f32 %v1959_v39, %v1419_v35 }
 0x195   : > { %v2164_v60 = vpop.eup %1625  ;;  %v1299_v43 = vadd.f32 %v1298_v61, %v1297_v5  ;;  %v1363_v14 = vadd.f32 %v1362_v34, %v1361_v2  ;;  %v1369_v59 = vrot.slane %v1368_v8, 4  ;;  %v1210_v15 = vsel %vm1199_vm15, %v1204_v48, %v1209_v57  ;;  %v1350_v2 = vpop.permute.xlu1 %1349 }
 0x196   : > { %v2167_v19 = vpop.eup %1627  ;;  %v1300_v3 = vmul.f32 -0.005, %v1292_v55  ;;  %v1432_v20 = vmul.f32 %v1421_v33, %v1421_v33  ;;  %v1212_v28 = vsub.f32 %v1974_v49, %v1210_v15  ;;  %v1277_v41 = vrot.slane %v1275_v4, 4 }
 0x197   : > { %v1301_v46 = vmul.f32 -0.005, %v1299_v43  ;;  %v1364_v24 = vrot.slane %v1363_v14, 2  ;;  %v1370_v27 = vadd.f32 %v1369_v59, %v1368_v8  ;;  %v1276_v45 = vrot.slane %v1273_v12, 4  ;;  %v1348_v43 = vpop.permute.xlu0 %1347 }
 0x198   : > { %v1302_v39 = vmul.f32 1.442695, %v1300_v3  ;;  %v1434_v47 = vcombine.high %v1432_v20, %v1432_v20  ;;  %v1436_v51 = vsel %vm622_vm11, %v1432_v20, 0.0  ;;  %v1237_v50 = vand.u32 2147483647, %v1212_v28 }
 0x199   : > { %v2171_v53 = vpop.eup %1629  ;;  %v1304_v54 = vmul.f32 1.442695, %v1301_v46  ;;  %v1365_v48 = vadd.f32 %v1364_v24, %v1363_v14  ;;  %v1371_v0 = vrot.slane %v1370_v27, 2  ;;  %v1437_v30 = vrot.slane %v1436_v51, 4 }
 0x19a   : > { %1635 = vpow2.f32 %v1302_v39  ;;  %v1443_v44 = vsel %vm622_vm11, %v1434_v47, 0.0  ;;  %v1239_v5 = vcombine.high %v1237_v50, %v1237_v50  ;;  %v1241_v17 = vsel %vm622_vm11, %v1237_v50, 0.0 }
 0x19b   : > { %v1632_v7 = vpop.eup %1631  ;;  %1637 = vpow2.f32 %v1304_v54  ;;  %v1366_v58 = vrot.slane %v1365_v48, 1  ;;  %v1372_v40 = vadd.f32 %v1371_v0, %v1370_v27  ;;  %v1438_v62 = vadd.f32 %v1437_v30, %v1436_v51 }
 0x19c   : > { %v1444_v61 = vrot.slane %v1443_v44, 4  ;;  %v1242_v34 = vrot.slane %v1241_v17, 4  ;;  %v1248_v35 = vsel %vm622_vm11, %v1239_v5, 0.0  ;;  %v1278_v57 = vsel %vm588_vm6, %v1276_v45, %v1277_v41 }
 0x19d   : > { %v1367_v4 = vadd.f32 %v1366_v58, %v1365_v48  ;;  %v1373_v55 = vrot.slane %v1372_v40, 1  ;;  %v1439_v8 = vrot.slane %v1438_v62, 2  ;;  %v1249_v33 = vrot.slane %v1248_v35, 4 }
 0x19e   : > { %v1634_v14 = vpop.eup %1633  ;;  %v1445_v59 = vadd.f32 %v1444_v61, %v1443_v44  ;;  %v1243_v15 = vadd.f32 %v1242_v34, %v1241_v17  ;;  %v1279_v3 = vsel %vm1268_vm0, %v1273_v12, %v1278_v57  ;;  %v1352_v20 = vrot.slane %v1350_v2, 4 }
 0x19f   : > { %v1374_v28 = vadd.f32 %v1373_v55, %v1372_v40  ;;  %v1375_v46 = vmul.f32 -0.005, %v1367_v4  ;;  %v1440_v24 = vadd.f32 %v1439_v8, %v1438_v62  ;;  %v1250_v27 = vadd.f32 %v1249_v33, %v1248_v35  ;;  %v1425_v8 = vpop.permute.xlu1 %1424 }
 0x1a0   : > { %v1446_v39 = vrot.slane %v1445_v59, 2  ;;  %v1244_v47 = vrot.slane %v1243_v15, 2  ;;  %v1281_v51 = vsub.f32 %v1974_v49, %v1279_v3  ;;  %v1351_v41 = vrot.slane %v1348_v43, 4 }
 0x1a1   : > { %v1376_v45 = vmul.f32 -0.005, %v1374_v28  ;;  %v1377_v50 = vmul.f32 1.442695, %v1375_v46  ;;  %v1441_v54 = vrot.slane %v1440_v24, 1  ;;  %v1251_v48 = vrot.slane %v1250_v27, 2 }
 0x1a2   : > { %v1447_v0 = vadd.f32 %v1446_v39, %v1445_v59  ;;  %v1245_v30 = vadd.f32 %v1244_v47, %v1243_v15  ;;  %v1306_v44 = vand.u32 2147483647, %v1281_v51  ;;  %v1353_v5 = vsel %vm588_vm6, %v1351_v41, %v1352_v20 }
 0x1a3   : > { %1639 = vpow2.f32 %v1377_v50  ;;  %v1379_v12 = vmul.f32 1.442695, %v1376_v45  ;;  %v1442_v17 = vadd.f32 %v1441_v54, %v1440_v24  ;;  %v1252_v58 = vadd.f32 %v1251_v48, %v1250_v27  ;;  %v1423_v27 = vpop.permute.xlu0 %1422 }
 0x1a4   : > { %v1636_v40 = vpop.eup %1635  ;;  %v1448_v62 = vrot.slane %v1447_v0, 1  ;;  %v1246_v2 = vrot.slane %v1245_v30, 1  ;;  %v1308_v61 = vcombine.high %v1306_v44, %v1306_v44  ;;  %v1310_v34 = vsel %vm622_vm11, %v1306_v44, 0.0 }
 0x1a5   : > { %v2181_v35 = vpop.eup %1637  ;;  %1641 = vpow2.f32 %v1379_v12  ;;  %v1450_v57 = vmul.f32 -0.005, %v1442_v17  ;;  %v1253_v4 = vrot.slane %v1252_v58, 1  ;;  %v1311_v55 = vrot.slane %v1310_v34, 4 }
 0x1a6   : > { %v1449_v33 = vadd.f32 %v1448_v62, %v1447_v0  ;;  %v1247_v59 = vadd.f32 %v1246_v2, %v1245_v30  ;;  %v1317_v15 = vsel %vm622_vm11, %v1308_v61, 0.0  ;;  %v1354_v3 = vsel %vm1343_vm1, %v1348_v43, %v1353_v5 }
 0x1a7   : > { %v1452_v20 = vmul.f32 1.442695, %v1450_v57  ;;  %v1254_v28 = vadd.f32 %v1253_v4, %v1252_v58  ;;  %v1312_v46 = vadd.f32 %v1311_v55, %v1310_v34  ;;  %v1318_v24 = vrot.slane %v1317_v15, 4 }
 0x1a8   : > { %v1451_v39 = vmul.f32 -0.005, %v1449_v33  ;;  %v2185_v47 = vmul.f32 %v1632_v7, %v1247_v59  ;;  %v1356_v51 = vsub.f32 %v1974_v49, %v1354_v3  ;;  %v1427_v41 = vrot.slane %v1425_v8, 4 }
 0x1a9   : > { %1643 = vpow2.f32 %v1452_v20  ;;  %v2188_v45 = vmul.f32 %v1634_v14, %v1254_v28  ;;  %v1313_v50 = vrot.slane %v1312_v46, 2  ;;  %v1319_v54 = vadd.f32 %v1318_v24, %v1317_v15 }
 0x1aa   : > { %v1454_v48 = vmul.f32 1.442695, %v1451_v39  ;;  %v1381_v0 = vand.u32 2147483647, %v1356_v51  ;;  %v1426_v30 = vrot.slane %v1423_v27, 4  ;;  %v664_v43 = vmul.f32 %v2099_v21, %v2086_v63 }
 0x1ab   : > { %v1314_v44 = vadd.f32 %v1313_v50, %v1312_v46  ;;  %v1320_v5 = vrot.slane %v1319_v54, 2  ;;  %v737_v12 = vrot.slane %v2094_v10, 1  ;;  %v740_v7 = vadd.f32 %v736_v11, %v2102_v22 }
 0x1ac   : > { %1645 = vpow2.f32 %v1454_v48  ;;  %v1383_v17 = vcombine.high %v1381_v0, %v1381_v0  ;;  %v1385_v14 = vsel %vm622_vm11, %v1381_v0, 0.0  ;;  %v1428_v58 = vsel %vm588_vm6, %v1426_v30, %v1427_v41 }
 0x1ad   : > { %v2198_v62 = vpop.eup %1639  ;;  %v1315_v2 = vrot.slane %v1314_v44, 1  ;;  %v1321_v61 = vadd.f32 %v1320_v5, %v1319_v54  ;;  %v1386_v34 = vrot.slane %v1385_v14, 4  ;;  %v1429_v21 = vsel %vm1418_vm2, %v1423_v27, %v1428_v58 }
 0x1ae   : > { %v1392_v57 = vsel %vm622_vm11, %v1383_v17, 0.0  ;;  %v1431_v10 = vsub.f32 %v1974_v49, %v1429_v21  ;;  %v741_v4 = vadd.f32 %v737_v12, %v664_v43  ;;  %v808_v26 = vmul.f32 %v2117_v16, %v2086_v63 }
 0x1af   : > { %v2205_v11 = vpop.eup %1641  ;;  %v1316_v22 = vadd.f32 %v1315_v2, %v1314_v44  ;;  %v1322_v55 = vrot.slane %v1321_v61, 1  ;;  %v1387_v8 = vadd.f32 %v1386_v34, %v1385_v14  ;;  %v1393_v33 = vrot.slane %v1392_v57, 4 }
 0x1b0   : > { %v1456_v59 = vand.u32 2147483647, %v1431_v10  ;;  %v811_v15 = vrot.slane %v2120_v6, 2  ;;  %v812_v3 = vrot.slane %v808_v26, 2  ;;  %v882_v20 = vmul.f32 %v2127_v37, %v2078_v52 }
 0x1b1   : > { %v2210_v28 = vadd.f32 %v1322_v55, %v1321_v61  ;;  %v2212_v49 = vmul.f32 %v1636_v40, %v1316_v22  ;;  %v1388_v46 = vrot.slane %v1387_v8, 2  ;;  %v1394_v24 = vadd.f32 %v1393_v33, %v1392_v57 }
 0x1b2   : > { %v1458_v16 = vcombine.high %v1456_v59, %v1456_v59  ;;  %v1460_v27 = vsel %vm622_vm11, %v1456_v59, 0.0  ;;  %v815_v39 = vadd.f32 %v811_v15, %v740_v7  ;;  %v816_v51 = vadd.f32 %v812_v3, %v741_v4 }
 0x1b3   : > { %v2215_v41 = vpop.eup %1643  ;;  %v1389_v50 = vadd.f32 %v1388_v46, %v1387_v8  ;;  %v1395_v54 = vrot.slane %v1394_v24, 2  ;;  %v1461_v6 = vrot.slane %v1460_v27, 4  ;;  %v883_v48 = vmul.f32 %v2131_v32, %v2086_v63 }
 0x1b4   : > { %v1467_v37 = vsel %vm622_vm11, %v1458_v16, 0.0  ;;  %v886_v0 = vrot.slane %v882_v20, 3  ;;  %v956_v40 = vmul.f32 %v2141_v9, %v2034_v13  ;;  %v957_v30 = vmul.f32 %v2139_v36, %v2078_v52 }
 0x1b5   : > { %v1390_v43 = vrot.slane %v1389_v50, 1  ;;  %v1396_v44 = vadd.f32 %v1395_v54, %v1394_v24  ;;  %v1462_v5 = vadd.f32 %v1461_v6, %v1460_v27  ;;  %v1468_v12 = vrot.slane %v1467_v37, 4 }
 0x1b6   : > { %v1646_v7 = vpop.eup %1645  ;;  %v887_v17 = vrot.slane %v883_v48, 3  ;;  %v890_v14 = vadd.f32 %v886_v0, %v815_v39  ;;  %v958_v58 = vmul.f32 %v956_v40, %v2086_v63  ;;  %v961_v2 = vrot.slane %v957_v30, 4 }
 0x1b7   : > { %v1391_v32 = vadd.f32 %v1390_v43, %v1389_v50  ;;  %v1397_v61 = vrot.slane %v1396_v44, 1  ;;  %v1463_v34 = vrot.slane %v1462_v5, 2  ;;  %v1469_v21 = vadd.f32 %v1468_v12, %v1467_v37 }
 0x1b8   : > { %v891_v57 = vadd.f32 %v887_v17, %v816_v51  ;;  %v962_v10 = vrot.slane %v958_v58, 4  ;;  %v965_v13 = vadd.f32 %v961_v2, %v890_v14  ;;  %v1030_v36 = vmul.f32 %v2148_v18, %v2036_v42  ;;  %v583_v18 = vld [vmem:[%s2267_s3 + $0x18] sm:$0xf] }
 0x1b9   : > { %v1398_v9 = vadd.f32 %v1397_v61, %v1396_v44  ;;  %v1464_v4 = vadd.f32 %v1463_v34, %v1462_v5  ;;  %v1470_v26 = vrot.slane %v1469_v21, 2  ;;  %v1031_v22 = vmul.f32 %v2151_v31, %v2041_v25  ;;  %v582_v25 = vld [vmem:[%s2267_s3 + $0x10] sm:$0xf] }
 0x1ba   : > { %v966_v55 = vadd.f32 %v962_v10, %v891_v57  ;;  %v1032_v8 = vmul.f32 %v1030_v36, %v2078_v52  ;;  %v1105_v33 = vmul.f32 %v2158_v1, %v2043_v29  ;;  %v1106_v59 = vmul.f32 %v2164_v60, %v2046_v38 }
 0x1bb   : > { %v1465_v15 = vrot.slane %v1464_v4, 1  ;;  %v1471_v3 = vadd.f32 %v1470_v26, %v1469_v21  ;;  %v1033_v20 = vmul.f32 %v1031_v22, %v2086_v63  ;;  %v1180_v42 = vmul.f32 %v2167_v19, %v2052_v56 }
 0x1bc   : > { %v1036_v31 = vrot.slane %v1032_v8, 5  ;;  %v1107_v29 = vmul.f32 %v1105_v33, %v2078_v52  ;;  %v1108_v38 = vmul.f32 %v1106_v59, %v2086_v63  ;;  %v1181_v1 = vmul.f32 %v2171_v53, %v2054_v23 }
 0x1bd   : > { %v1466_v60 = vadd.f32 %v1465_v15, %v1464_v4  ;;  %v1472_v46 = vrot.slane %v1471_v3, 1  ;;  %v1037_v24 = vrot.slane %v1033_v20, 5  ;;  %v1182_v56 = vmul.f32 %v1180_v42, %v2078_v52 }
 0x1be   : > { %v1040_v19 = vadd.f32 %v1036_v31, %v965_v13  ;;  %v1111_v16 = vrot.slane %v1107_v29, 6  ;;  %v1112_v27 = vrot.slane %v1108_v38, 6  ;;  %v1183_v39 = vmul.f32 %v1181_v1, %v2086_v63 }
 0x1bf   : > { %v1041_v51 = vadd.f32 %v1037_v24, %v966_v55  ;;  %v1186_v50 = vrot.slane %v1182_v56, 7  ;;  %v1257_v54 = vmul.f32 %v2185_v47, %v582_v25  ;;  %v1258_v6 = vmul.f32 %v2188_v45, %v583_v18 }
 0x1c0   : > { %v1115_v48 = vadd.f32 %v1111_v16, %v1040_v19  ;;  %v1187_v37 = vrot.slane %v1183_v39, 7  ;;  %v1325_v23 = vmul.f32 %v2181_v35, %v2210_v28  ;;  %v1326_v53 = vmul.f32 %v2212_v49, %v582_v25 }
 0x1c1   : > { %v1116_v0 = vadd.f32 %v1112_v27, %v1041_v51  ;;  %v1399_v52 = vmul.f32 %v2198_v62, %v1391_v32  ;;  %v1400_v40 = vmul.f32 %v2205_v11, %v1398_v9  ;;  %v1473_v30 = vadd.f32 %v1472_v46, %v1471_v3 }
 0x1c2   : > { %v1190_v63 = vadd.f32 %v1186_v50, %v1115_v48  ;;  %v1327_v43 = vmul.f32 %v1325_v23, %v583_v18  ;;  %v1330_v44 = vrot.slane %v1326_v53, 1  ;;  %v1474_v47 = vmul.f32 %v2215_v41, %v1466_v60 }
 0x1c3   : > { %v1191_v5 = vadd.f32 %v1187_v37, %v1116_v0  ;;  %v1401_v45 = vmul.f32 %v1399_v52, %v582_v25  ;;  %v1402_v12 = vmul.f32 %v1400_v40, %v583_v18  ;;  %v1475_v17 = vmul.f32 %v1646_v7, %v1473_v30 }
 0x1c4   : > { %v1259_v14 = vadd.f32 %v1257_v54, %v1190_v63  ;;  %v1331_v58 = vrot.slane %v1327_v43, 1  ;;  %v1476_v35 = vmul.f32 %v1474_v47, %v582_v25 }
 0x1c5   : > { %v1260_v28 = vadd.f32 %v1258_v6, %v1191_v5  ;;  %v1405_v49 = vrot.slane %v1401_v45, 2  ;;  %v1406_v2 = vrot.slane %v1402_v12, 2  ;;  %v1477_v61 = vmul.f32 %v1475_v17, %v583_v18 }
 0x1c6   : > { %v1334_v62 = vadd.f32 %v1330_v44, %v1259_v14  ;;  %v1480_v32 = vrot.slane %v1476_v35, 3 }
 0x1c7   : > { %v1335_v11 = vadd.f32 %v1331_v58, %v1260_v28  ;;  %v1481_v34 = vrot.slane %v1477_v61, 3 }
 0x1c8   : > { %v1409_v21 = vadd.f32 %v1405_v49, %v1334_v62 }
 0x1c9   : > { %v1410_v57 = vadd.f32 %v1406_v2, %v1335_v11 }
 0x1ca   : > { %v1484_v10 = vadd.f32 %v1480_v32, %v1409_v21 }
 0x1cb   : > { %v1485_v41 = vadd.f32 %v1481_v34, %v1410_v57 }
 0x1cc   : > { %v1487_v13 = vsel %vm1486_vm3, %v1484_v10, 0.0 }
 0x1cd   : > { %v1488_v36 = vsel %vm1486_vm3, %v1485_v41, 0.0 }
 0x1ce   : > { %v1489_v7 = vadd.f32 %v1488_v36, %v1487_v13 }
 0x1d0   : > { %1490 = vadd.xlane.f32.xlu0 %v1489_v7 }
 0x25d   : > { %v1491_v9 = vpop.xlane.xlu0 %1490 }
 0x25e   : > { %v1492_v4 = vrot.slane %v1491_v9, 4 }
 0x260   : > { %v1493_v26 = vadd.f32 %v1492_v4, %v1491_v9 }
 0x262   : > { %v1494_v22 = vrot.slane %v1493_v26, 2 }
 0x264   : > { %v1495_v55 = vadd.f32 %v1494_v22, %v1493_v26 }
 0x266   : > { %v1496_v8 = vrot.slane %v1495_v55, 1 }
 0x268   : > { %v1497_v33 = vadd.f32 %v1496_v8, %v1495_v55 }
 0x26a   : > { %1571 = vpush %v1497_v33 }
 0x29b   : > { %s1572_s14 = spop %1571 }
 0x29c   : > { %v1499_v59 = vstv %s1572_s14 }
 0x29d   : > { %1501 = vst.msk [vmem:[%s210_s13] sm:$0x1] %vm1500_vm4, %v1499_v59 }
 0x29e PF: > { %s14_s15 = sadd.s32 1, %s1653_s15  }
 0x29f   : > { %p11_p4 = scmp.ge.s32.totalorder %s14_s15, 4  }
 0x2a1   :  { %13 = sbr.rel (!%p11_p4) target bundleno = 1 (0x1), region = 72 }

</bundles_post_ra>
